<compile_context>
chip_gen: v5e
topology: v5e:2x2
jax: 0.10.0
libtpu: 0.0.40
codegen_flags: <defaults>
</compile_context>

<pallas_src>
import functools

import jax
import jax.numpy as jnp
from jax.experimental import pallas as pl
from jax.experimental.pallas import tpu as pltpu


# ---------------------------------------------------------------------------
# Small helpers
# ---------------------------------------------------------------------------
def _round_up(n, m):
    return ((n + m - 1) // m) * m


def _pad2d(a, rows, cols):
    r, c = a.shape
    if r == rows and c == cols:
        return a
    return jnp.pad(a, ((0, rows - r), (0, cols - c)))


def _vmem_capacity_bytes():
    """Per-TensorCore VMEM capacity (128 MiB v5e/v6e, 64 MiB v7x)."""
    try:
        info = pltpu.get_tpu_info()
        cap = int(getattr(info, "vmem_capacity_bytes", 0))
        if cap > 0:
            return cap
    except Exception:
        pass
    return 64 << 20  # conservative default (v7x per-TC VMEM)


def _resident_vmem_bytes(tm, d, x_itemsize, wbuf):
    """VMEM estimate for the fused kernel with VMEM-resident weights."""
    weight_bytes = 4 * d * d * 2 * wbuf          # four bf16 (D, D) weights
    bias_bytes = 4 * d * 4 * wbuf                # four f32 (1, D) biases
    io_bytes = 2 * tm * d * x_itemsize           # x tile, double-buffered
    io_bytes += 2 * 2 * tm * d * 4               # t / r output tiles, double-buffered
    scratch = 4 * tm * d * 4                     # f32 / bf16 intermediates headroom
    return weight_bytes + bias_bytes + io_bytes + scratch + (4 << 20)


def _choose_tm(M, D_pad, budget, weight_bytes, x_itemsize):
    """Largest row tile that fits the VMEM budget, minimizes row padding and
    keeps >= 2 grid steps for large M (so v7x megacore can shard rows)."""
    m_ceil = _round_up(max(M, 1), 8)
    cands = sorted({t for t in (512, 256, 128, 64, 32, 16, 8, m_ceil)
                    if 8 <= t <= m_ceil and t % 8 == 0}, reverse=True)
    best, best_key = None, None
    for tm in cands:
        if weight_bytes + _resident_vmem_bytes(tm, D_pad, x_itemsize, 1) \
                - weight_bytes > budget - weight_bytes:
            # (keep full estimate comparison explicit below)
            pass
        if _resident_vmem_bytes(tm, D_pad, x_itemsize, 1) > budget:
            continue
        m_pad = _round_up(max(M, 1), tm)
        steps = m_pad // tm
        waste = m_pad - M
        key = (1 if (M >= 256 and steps < 2) else 0, waste, -tm)
        if best_key is None or key < best_key:
            best, best_key = tm, key
    return best


def _pick_tile(D_pad, cap=512):
    """Largest multiple of 128 that divides D_pad, capped."""
    for t in (512, 384, 256, 128):
        if t <= cap and D_pad % t == 0:
            return t
    return min(D_pad, 128)


# ---------------------------------------------------------------------------
# Fused resident-weight kernel (both MLPs in one pallas_call)
# ---------------------------------------------------------------------------
def _cvp_kernel(x_ref,
                tw1_ref, tb1_ref, tw2_ref, tb2_ref,
                rw1_ref, rb1_ref, rw2_ref, rb2_ref,
                t_ref, r_ref):
    """Fused transform + retransform MLPs for one (tm, D) tile of rows."""
    x = x_ref[...].astype(jnp.bfloat16)

    # transform_module: relu(relu(x W1 + b1) W2 + b2), f32 accumulation.
    h = jnp.dot(x, tw1_ref[...], preferred_element_type=jnp.float32) + tb1_ref[...]
    h = jnp.maximum(h, 0.0)
    t = jnp.dot(h.astype(jnp.bfloat16), tw2_ref[...],
                preferred_element_type=jnp.float32) + tb2_ref[...]
    t = jnp.maximum(t, 0.0)
    t_ref[...] = t.astype(t_ref.dtype)

    # retransform_module consumes t directly (no HBM round trip).
    h2 = jnp.dot(t.astype(jnp.bfloat16), rw1_ref[...],
                 preferred_element_type=jnp.float32) + rb1_ref[...]
    h2 = jnp.maximum(h2, 0.0)
    r = jnp.dot(h2.astype(jnp.bfloat16), rw2_ref[...],
                preferred_element_type=jnp.float32) + rb2_ref[...]
    r_ref[...] = jnp.maximum(r, 0.0).astype(r_ref.dtype)


@functools.partial(jax.jit,
                   static_argnames=("tm", "single_buffer_weights", "vmem_limit"))
def _fused_mlp2(x2d, tw1, tb1, tw2, tb2, rw1, rb1, rw2, rb2,
                *, tm, single_buffer_weights, vmem_limit):
    """x2d: (M, D) f32/bf16 with M % tm == 0, D % 128 == 0.  Returns (t, r)."""
    M, D = x2d.shape
    grid = (M // tm,)
    x_bytes = jnp.dtype(x2d.dtype).itemsize

    def const_spec(shape):
        # Weights/biases: constant block index; single-buffered to halve their
        # VMEM footprint when this JAX build supports pipeline_mode.
        if single_buffer_weights:
            return pl.BlockSpec(shape, lambda i: (0, 0),
                                pipeline_mode=pl.Buffered(1))
        return pl.BlockSpec(shape, lambda i: (0, 0))

    def row_spec():
        return pl.BlockSpec((tm, D), lambda i: (i, 0))

    cost = pl.CostEstimate(
        flops=2 * 4 * M * D * D,
        transcendentals=0,
        bytes_accessed=M * D * x_bytes + 4 * D * D * 2 + 4 * D * 4 + 2 * M * D * 4,
    )

    return pl.pallas_call(
        _cvp_kernel,
        out_shape=(jax.ShapeDtypeStruct((M, D), jnp.float32),
                   jax.ShapeDtypeStruct((M, D), jnp.float32)),
        grid_spec=pltpu.PrefetchScalarGridSpec(
            num_scalar_prefetch=0,
            grid=grid,
            in_specs=[
                row_spec(),               # x row tile
                const_spec((D, D)),       # transform W1^T (bf16, resident)
                const_spec((1, D)),       # transform b1
                const_spec((D, D)),       # transform W2^T
                const_spec((1, D)),       # transform b2
                const_spec((D, D)),       # retransform W1^T
                const_spec((1, D)),       # retransform b1
                const_spec((D, D)),       # retransform W2^T
                const_spec((1, D)),       # retransform b2
            ],
            out_specs=(row_spec(), row_spec()),
        ),
        compiler_params=pltpu.CompilerParams(
            dimension_semantics=("parallel",),
            vmem_limit_bytes=vmem_limit,
        ),
        cost_estimate=cost,
    )(x2d, tw1, tb1, tw2, tb2, rw1, rb1, rw2, rb2)


# ---------------------------------------------------------------------------
# Weight-streaming fallback: tiled linear(+bias)+ReLU with f32 accumulator.
# Used when the four (D_pad, D_pad) weights cannot stay VMEM-resident
# (e.g. D >= ~2048 on v7x's 64 MiB VMEM).
# ---------------------------------------------------------------------------
def _tiled_linear_relu_kernel(x_ref, w_ref, b_ref, o_ref, acc_ref):
    @pl.when(pl.program_id(2) == 0)
    def _():
        acc_ref[...] = jnp.zeros_like(acc_ref)

    acc_ref[...] += jnp.dot(x_ref[...].astype(jnp.bfloat16), w_ref[...],
                            preferred_element_type=jnp.float32)

    @pl.when(pl.program_id(2) == pl.num_programs(2) - 1)
    def _():
        o_ref[...] = jnp.maximum(acc_ref[...] + b_ref[...], 0.0).astype(o_ref.dtype)


@functools.partial(jax.jit, static_argnames=("tm", "tn", "tk", "vmem_limit"))
def _tiled_linear_relu(x, w, b, *, tm, tn, tk, vmem_limit):
    """relu(x @ w + b): x (M, K) f32/bf16, w (K, N) bf16, b (1, N) f32."""
    M, K = x.shape
    _, N = w.shape
    x_bytes = jnp.dtype(x.dtype).itemsize
    grid = (M // tm, N // tn, K // tk)

    cost = pl.CostEstimate(
        flops=2 * M * N * K,
        transcendentals=0,
        bytes_accessed=M * K * x_bytes + K * N * 2 + N * 4 + M * N * 4,
    )

    return pl.pallas_call(
        _tiled_linear_relu_kernel,
        out_shape=jax.ShapeDtypeStruct((M, N), jnp.float32),
        grid_spec=pltpu.PrefetchScalarGridSpec(
            num_scalar_prefetch=0,
            grid=grid,
            in_specs=[
                pl.BlockSpec((tm, tk), lambda i, j, k: (i, k)),
                pl.BlockSpec((tk, tn), lambda i, j, k: (k, j)),
                pl.BlockSpec((1, tn), lambda i, j, k: (0, j)),
            ],
            out_specs=pl.BlockSpec((tm, tn), lambda i, j, k: (i, j)),
            scratch_shapes=[pltpu.VMEM((tm, tn), jnp.float32)],
        ),
        compiler_params=pltpu.CompilerParams(
            dimension_semantics=("parallel", "parallel", "arbitrary"),
            vmem_limit_bytes=vmem_limit,
        ),
        cost_estimate=cost,
    )(x, w, b)


def _tiled_cvp(x_p, weights, *, tm, cap, tile_cap=512):
    """Run both MLPs with streamed (tiled) weights.  x_p: (M_pad, D_pad)."""
    D_pad = x_p.shape[1]
    tn = tk = _pick_tile(D_pad, tile_cap)
    limit_cap = max(cap - (12 << 20), 28 << 20)
    est = (2 * tm * tk * 4 + 2 * tk * tn * 2 + 2 * tn * 4
           + 2 * tm * tn * 4 + tm * tn * 4 + (4 << 20))
    vlim = int(min(max(est, 32 << 20), limit_cap))

    tw1, tb1, tw2, tb2, rw1, rb1, rw2, rb2 = weights
    h = _tiled_linear_relu(x_p, tw1, tb1, tm=tm, tn=tn, tk=tk, vmem_limit=vlim)
    t = _tiled_linear_relu(h, tw2, tb2, tm=tm, tn=tn, tk=tk, vmem_limit=vlim)
    h2 = _tiled_linear_relu(t, rw1, rb1, tm=tm, tn=tn, tk=tk, vmem_limit=vlim)
    r = _tiled_linear_relu(h2, rw2, rb2, tm=tm, tn=tn, tk=tk, vmem_limit=vlim)
    return t, r


# ---------------------------------------------------------------------------
# Dispatch: resident-weight fused path if it fits VMEM, else stream weights.
# ---------------------------------------------------------------------------
def _fused_cvp(x2d, prepared, *, tm=None):
    M, D = x2d.shape
    D_pad = prepared["dim_pad"]
    weights = prepared["weights"]
    x_isize = jnp.dtype(x2d.dtype).itemsize

    cap = _vmem_capacity_bytes()
    budget = max(cap - (16 << 20), 24 << 20)     # what we let one kernel use
    limit_cap = max(cap - (12 << 20), 28 << 20)  # hard cap for vmem_limit_bytes

    resident_w_bytes = 4 * D_pad * D_pad * 2 + 4 * D_pad * 4

    if tm is not None:
        tm_res = max(8, min(_round_up(tm, 8), _round_up(max(M, 1), 8)))
    else:
        tm_res = _choose_tm(M, D_pad, budget, resident_w_bytes, x_isize)

    if tm_res is not None:
        M_pad = _round_up(max(M, 1), tm_res)
        x_p = _pad2d(x2d, M_pad, D_pad)
        est1 = _resident_vmem_bytes(tm_res, D_pad, x_isize, wbuf=1)
        try:
            t_p, r_p = _fused_mlp2(
                x_p, *weights, tm=tm_res, single_buffer_weights=True,
                vmem_limit=int(min(max(est1, 32 << 20), limit_cap)))
            return t_p[:M, :D], r_p[:M, :D]
        except Exception:
            # Retry with default (double-buffered) weight BlockSpecs ONLY if
            # that larger footprint actually fits this generation's budget;
            # otherwise fall through to the weight-streaming path.
            est2 = _resident_vmem_bytes(tm_res, D_pad, x_isize, wbuf=2)
            if est2 <= budget:
                try:
                    t_p, r_p = _fused_mlp2(
                        x_p, *weights, tm=tm_res, single_buffer_weights=False,
                        vmem_limit=int(min(max(est2, 32 << 20), limit_cap)))
                    return t_p[:M, :D], r_p[:M, :D]
                except Exception:
                    pass

    # Weight-streaming fallback (large D / tight VMEM, e.g. D >= 2048 on v7x).
    tm_t = tm_res if tm_res is not None else min(256, _round_up(max(M, 1), 8))
    M_pad = _round_up(max(M, 1), tm_t)
    x_p = _pad2d(x2d, M_pad, D_pad)
    t_p, r_p = _tiled_cvp(x_p, weights, tm=tm_t, cap=cap)
    return t_p[:M, :D], r_p[:M, :D]


# ---------------------------------------------------------------------------
# Parameters (init once, prep once)
# ---------------------------------------------------------------------------
def _init_linear(key, in_dim, out_dim):
    """Deterministic init matching nn.Linear's default U(-1/sqrt(in), 1/sqrt(in))."""
    kw, kb = jax.random.split(key)
    bound = 1.0 / jnp.sqrt(jnp.float32(in_dim))
    # Stored already transposed: (in_dim, out_dim) so kernels do x @ W.
    w_t = jax.random.uniform(kw, (in_dim, out_dim), jnp.float32, -bound, bound)
    b = jax.random.uniform(kb, (1, out_dim), jnp.float32, -bound, bound)
    return w_t, b


def make_transform_params(key, input_dim):
    """Params for one TransformModule: Linear -> ReLU -> Linear -> ReLU."""
    k1, k2 = jax.random.split(key)
    w1_t, b1 = _init_linear(k1, input_dim, input_dim)
    w2_t, b2 = _init_linear(k2, input_dim, input_dim)
    return (w1_t, b1, w2_t, b2)


def prepare_cvp_params(transform_params, retransform_params):
    """One-time weight prep (pad to D_pad, cast weights to bf16).

    Doing this once keeps the per-forward path free of the 8 pad/cast XLA ops
    that would otherwise re-read all four f32 (D, D) weights from HBM."""
    D = int(transform_params[0].shape[0])
    D_pad = _round_up(D, 128)

    def prep(params):
        w1_t, b1, w2_t, b2 = params
        return (
            _pad2d(jnp.asarray(w1_t, jnp.float32), D_pad, D_pad).astype(jnp.bfloat16),
            _pad2d(jnp.asarray(b1, jnp.float32).reshape(1, -1), 1, D_pad),
            _pad2d(jnp.asarray(w2_t, jnp.float32), D_pad, D_pad).astype(jnp.bfloat16),
            _pad2d(jnp.asarray(b2, jnp.float32).reshape(1, -1), 1, D_pad),
        )

    weights = prep(transform_params) + prep(retransform_params)
    weights = jax.block_until_ready(weights)  # materialize once, up front
    return {"weights": tuple(weights), "dim": D, "dim_pad": D_pad}


def cycled_view_projection(x, prepared_params, *, tm=None):
    """Pallas implementation of CycledViewProjection.forward.

    x: (B, C, H, W) float32 or bfloat16, H == W (as the PyTorch module assumes).
    prepared_params: output of prepare_cvp_params(...).
    Returns (transform_feature, retransform_features), both (B, C, H, H) f32.
    """
    B, C, H, W = x.shape
    assert H == W, "CycledViewProjection assumes square spatial dims (H == W)"
    D = H * W
    assert prepared_params["dim"] == D, "params prepared for a different input_dim"

    x2d = x.reshape(B * C, D)
    if x2d.dtype not in (jnp.dtype(jnp.float32), jnp.dtype(jnp.bfloat16)):
        x2d = x2d.astype(jnp.float32)

    t2d, r2d = _fused_cvp(x2d, prepared_params, tm=tm)
    return t2d.reshape(B, C, H, H), r2d.reshape(B, C, H, H)


# ---------------------------------------------------------------------------
# Pure-JAX reference with the same bf16-operand / f32-accum contract
# ---------------------------------------------------------------------------
def _reference(x, transform_params, retransform_params):
    def mlp(x2d, params):
        w1_t, b1, w2_t, b2 = params
        h = jnp.dot(x2d.astype(jnp.bfloat16), w1_t.astype(jnp.bfloat16),
                    preferred_element_type=jnp.float32) + b1
        h = jnp.maximum(h, 0.0)
        y = jnp.dot(h.astype(jnp.bfloat16), w2_t.astype(jnp.bfloat16),
                    preferred_element_type=jnp.float32) + b2
        return jnp.maximum(y, 0.0)

    B, C, H, W = x.shape
    x2d = x.reshape(B * C, H * W)
    t = mlp(x2d, transform_params)
    r = mlp(t, retransform_params)
    return t.reshape(B, C, H, H), r.reshape(B, C, H, H)


if __name__ == "__main__":
    key = jax.random.PRNGKey(0)
    k_x, k_t, k_r = jax.random.split(key, 3)

    B, C, H, W = 2, 4, 16, 16
    x = jax.random.normal(k_x, (B, C, H, W), jnp.float32)

    transform_params = make_transform_params(k_t, H * W)
    retransform_params = make_transform_params(k_r, H * W)
    prepared = prepare_cvp_params(transform_params, retransform_params)

    # Main (fused, resident-weight) path.
    tf, rf = cycled_view_projection(x, prepared)
    tf = jax.block_until_ready(tf)
    rf = jax.block_until_ready(rf)

    tf_ref, rf_ref = _reference(x, transform_params, retransform_params)
    assert tf.shape == (B, C, H, H) and rf.shape == (B, C, H, H)
    assert jnp.allclose(tf, tf_ref, atol=1e-2, rtol=1e-2), "transform mismatch"
    assert jnp.allclose(rf, rf_ref, atol=1e-2, rtol=1e-2), "retransform mismatch"

    # Also exercise the weight-streaming fallback once (small tiles so the
    # K-accumulation path is actually used) to validate it lowers correctly.
    M, D = B * C, H * W
    x2d = x.reshape(M, D)
    x_p = _pad2d(x2d, _round_up(M, 8), prepared["dim_pad"])
    t_t, r_t = _tiled_cvp(x_p, prepared["weights"], tm=8,
                          cap=_vmem_capacity_bytes(), tile_cap=128)
    t_t = jax.block_until_ready(t_t)[:M, :D].reshape(B, C, H, H)
    r_t = r_t[:M, :D].reshape(B, C, H, H)
    assert jnp.allclose(t_t, tf_ref, atol=1e-2, rtol=1e-2), "tiled transform mismatch"
    assert jnp.allclose(r_t, rf_ref, atol=1e-2, rtol=1e-2), "tiled retransform mismatch"

    print("KERNEL_OK")
</pallas_src>

<mosaic_0001>
module attributes {stable_mosaic.version = 11 : i64} {
  func.func @_cvp_kernel(%arg0: i32, %arg1: memref<8x256xf32, #tpu.memory_space<vmem>>, %arg2: memref<256x256xbf16, #tpu.memory_space<vmem>>, %arg3: memref<1x256xf32, #tpu.memory_space<vmem>>, %arg4: memref<256x256xbf16, #tpu.memory_space<vmem>>, %arg5: memref<1x256xf32, #tpu.memory_space<vmem>>, %arg6: memref<256x256xbf16, #tpu.memory_space<vmem>>, %arg7: memref<1x256xf32, #tpu.memory_space<vmem>>, %arg8: memref<256x256xbf16, #tpu.memory_space<vmem>>, %arg9: memref<1x256xf32, #tpu.memory_space<vmem>>, %arg10: memref<8x256xf32, #tpu.memory_space<vmem>>, %arg11: memref<8x256xf32, #tpu.memory_space<vmem>>) attributes {dimension_semantics = [#tpu.dimension_semantics<parallel>], iteration_bounds = array<i64: 1>, scalar_prefetch = 0 : i64, scratch_operands = 0 : i64, tpu.core_type = #tpu.core_type<tc>, window_params = [{transform_indices = @transform_0, window_bounds = array<i64: 8, 256>}, {pipeline_mode = #tpu.pipeline_mode<synchronous>, transform_indices = @transform_1, window_bounds = array<i64: 256, 256>}, {pipeline_mode = #tpu.pipeline_mode<synchronous>, transform_indices = @transform_2, window_bounds = array<i64: 1, 256>}, {pipeline_mode = #tpu.pipeline_mode<synchronous>, transform_indices = @transform_3, window_bounds = array<i64: 256, 256>}, {pipeline_mode = #tpu.pipeline_mode<synchronous>, transform_indices = @transform_4, window_bounds = array<i64: 1, 256>}, {pipeline_mode = #tpu.pipeline_mode<synchronous>, transform_indices = @transform_5, window_bounds = array<i64: 256, 256>}, {pipeline_mode = #tpu.pipeline_mode<synchronous>, transform_indices = @transform_6, window_bounds = array<i64: 1, 256>}, {pipeline_mode = #tpu.pipeline_mode<synchronous>, transform_indices = @transform_7, window_bounds = array<i64: 256, 256>}, {pipeline_mode = #tpu.pipeline_mode<synchronous>, transform_indices = @transform_8, window_bounds = array<i64: 1, 256>}, {transform_indices = @transform_9, window_bounds = array<i64: 8, 256>}, {transform_indices = @transform_10, window_bounds = array<i64: 8, 256>}]} {
    %c0 = arith.constant 0 : index
    %c0_0 = arith.constant 0 : index
    %0 = vector.load %arg1[%c0, %c0_0] : memref<8x256xf32, #tpu.memory_space<vmem>>, vector<8x256xf32>
    %1 = arith.truncf %0 : vector<8x256xf32> to vector<8x256xbf16>
    %c0_1 = arith.constant 0 : index
    %c0_2 = arith.constant 0 : index
    %2 = vector.load %arg2[%c0_1, %c0_2] : memref<256x256xbf16, #tpu.memory_space<vmem>>, vector<256x256xbf16>
    %cst = arith.constant dense<0.000000e+00> : vector<8x256xf32>
    %3 = tpu.matmul %1, %2, %cst {dimension_numbers = #tpu.dot_dimension_numbers<[1], [0], [0], [1], [0, 0, 1, 1], [], []>} : vector<8x256xbf16>, vector<256x256xbf16>, vector<8x256xf32> -> vector<8x256xf32>
    %c0_3 = arith.constant 0 : index
    %c0_4 = arith.constant 0 : index
    %4 = vector.load %arg3[%c0_3, %c0_4] : memref<1x256xf32, #tpu.memory_space<vmem>>, vector<1x256xf32>
    %5 = vector.broadcast %4 : vector<1x256xf32> to vector<8x256xf32>
    %6 = arith.addf %3, %5 : vector<8x256xf32>
    %cst_5 = arith.constant 0.000000e+00 : f32
    %7 = vector.broadcast %cst_5 : f32 to vector<8x256xf32>
    %8 = arith.maximumf %6, %7 : vector<8x256xf32>
    %9 = arith.truncf %8 : vector<8x256xf32> to vector<8x256xbf16>
    %c0_6 = arith.constant 0 : index
    %c0_7 = arith.constant 0 : index
    %10 = vector.load %arg4[%c0_6, %c0_7] : memref<256x256xbf16, #tpu.memory_space<vmem>>, vector<256x256xbf16>
    %cst_8 = arith.constant dense<0.000000e+00> : vector<8x256xf32>
    %11 = tpu.matmul %9, %10, %cst_8 {dimension_numbers = #tpu.dot_dimension_numbers<[1], [0], [0], [1], [0, 0, 1, 1], [], []>} : vector<8x256xbf16>, vector<256x256xbf16>, vector<8x256xf32> -> vector<8x256xf32>
    %c0_9 = arith.constant 0 : index
    %c0_10 = arith.constant 0 : index
    %12 = vector.load %arg5[%c0_9, %c0_10] : memref<1x256xf32, #tpu.memory_space<vmem>>, vector<1x256xf32>
    %13 = vector.broadcast %12 : vector<1x256xf32> to vector<8x256xf32>
    %14 = arith.addf %11, %13 : vector<8x256xf32>
    %cst_11 = arith.constant 0.000000e+00 : f32
    %15 = vector.broadcast %cst_11 : f32 to vector<8x256xf32>
    %16 = arith.maximumf %14, %15 : vector<8x256xf32>
    %c0_12 = arith.constant 0 : index
    %c0_13 = arith.constant 0 : index
    %17 = vector.load %arg10[%c0_12, %c0_13] : memref<8x256xf32, #tpu.memory_space<vmem>>, vector<8x256xf32>
    tpu.vector_store %arg10[%c0_12, %c0_13], %16 {strides = array<i32>} : memref<8x256xf32, #tpu.memory_space<vmem>>, vector<8x256xf32>,
    %18 = arith.truncf %16 : vector<8x256xf32> to vector<8x256xbf16>
    %c0_14 = arith.constant 0 : index
    %c0_15 = arith.constant 0 : index
    %19 = vector.load %arg6[%c0_14, %c0_15] : memref<256x256xbf16, #tpu.memory_space<vmem>>, vector<256x256xbf16>
    %cst_16 = arith.constant dense<0.000000e+00> : vector<8x256xf32>
    %20 = tpu.matmul %18, %19, %cst_16 {dimension_numbers = #tpu.dot_dimension_numbers<[1], [0], [0], [1], [0, 0, 1, 1], [], []>} : vector<8x256xbf16>, vector<256x256xbf16>, vector<8x256xf32> -> vector<8x256xf32>
    %c0_17 = arith.constant 0 : index
    %c0_18 = arith.constant 0 : index
    %21 = vector.load %arg7[%c0_17, %c0_18] : memref<1x256xf32, #tpu.memory_space<vmem>>, vector<1x256xf32>
    %22 = vector.broadcast %21 : vector<1x256xf32> to vector<8x256xf32>
    %23 = arith.addf %20, %22 : vector<8x256xf32>
    %cst_19 = arith.constant 0.000000e+00 : f32
    %24 = vector.broadcast %cst_19 : f32 to vector<8x256xf32>
    %25 = arith.maximumf %23, %24 : vector<8x256xf32>
    %26 = arith.truncf %25 : vector<8x256xf32> to vector<8x256xbf16>
    %c0_20 = arith.constant 0 : index
    %c0_21 = arith.constant 0 : index
    %27 = vector.load %arg8[%c0_20, %c0_21] : memref<256x256xbf16, #tpu.memory_space<vmem>>, vector<256x256xbf16>
    %cst_22 = arith.constant dense<0.000000e+00> : vector<8x256xf32>
    %28 = tpu.matmul %26, %27, %cst_22 {dimension_numbers = #tpu.dot_dimension_numbers<[1], [0], [0], [1], [0, 0, 1, 1], [], []>} : vector<8x256xbf16>, vector<256x256xbf16>, vector<8x256xf32> -> vector<8x256xf32>
    %c0_23 = arith.constant 0 : index
    %c0_24 = arith.constant 0 : index
    %29 = vector.load %arg9[%c0_23, %c0_24] : memref<1x256xf32, #tpu.memory_space<vmem>>, vector<1x256xf32>
    %30 = vector.broadcast %29 : vector<1x256xf32> to vector<8x256xf32>
    %31 = arith.addf %28, %30 : vector<8x256xf32>
    %cst_25 = arith.constant 0.000000e+00 : f32
    %32 = vector.broadcast %cst_25 : f32 to vector<8x256xf32>
    %33 = arith.maximumf %31, %32 : vector<8x256xf32>
    %c0_26 = arith.constant 0 : index
    %c0_27 = arith.constant 0 : index
    %34 = vector.load %arg11[%c0_26, %c0_27] : memref<8x256xf32, #tpu.memory_space<vmem>>, vector<8x256xf32>
    tpu.vector_store %arg11[%c0_26, %c0_27], %33 {strides = array<i32>} : memref<8x256xf32, #tpu.memory_space<vmem>>, vector<8x256xf32>,
    return
  }
  func.func @transform_0(%arg0: i32) -> (i32, i32) {
    %c0_i32 = arith.constant 0 : i32
    %c0_i32_0 = arith.constant 0 : i32
    return %arg0, %c0_i32 : i32, i32
  }
  func.func @transform_1(%arg0: i32) -> (i32, i32) {
    %c0_i32 = arith.constant 0 : i32
    %c0_i32_0 = arith.constant 0 : i32
    %c0_i32_1 = arith.constant 0 : i32
    return %c0_i32, %c0_i32_0 : i32, i32
  }
  func.func @transform_2(%arg0: i32) -> (i32, i32) {
    %c0_i32 = arith.constant 0 : i32
    %c0_i32_0 = arith.constant 0 : i32
    %c0_i32_1 = arith.constant 0 : i32
    return %c0_i32, %c0_i32_0 : i32, i32
  }
  func.func @transform_3(%arg0: i32) -> (i32, i32) {
    %c0_i32 = arith.constant 0 : i32
    %c0_i32_0 = arith.constant 0 : i32
    %c0_i32_1 = arith.constant 0 : i32
    return %c0_i32, %c0_i32_0 : i32, i32
  }
  func.func @transform_4(%arg0: i32) -> (i32, i32) {
    %c0_i32 = arith.constant 0 : i32
    %c0_i32_0 = arith.constant 0 : i32
    %c0_i32_1 = arith.constant 0 : i32
    return %c0_i32, %c0_i32_0 : i32, i32
  }
  func.func @transform_5(%arg0: i32) -> (i32, i32) {
    %c0_i32 = arith.constant 0 : i32
    %c0_i32_0 = arith.constant 0 : i32
    %c0_i32_1 = arith.constant 0 : i32
    return %c0_i32, %c0_i32_0 : i32, i32
  }
  func.func @transform_6(%arg0: i32) -> (i32, i32) {
    %c0_i32 = arith.constant 0 : i32
    %c0_i32_0 = arith.constant 0 : i32
    %c0_i32_1 = arith.constant 0 : i32
    return %c0_i32, %c0_i32_0 : i32, i32
  }
  func.func @transform_7(%arg0: i32) -> (i32, i32) {
    %c0_i32 = arith.constant 0 : i32
    %c0_i32_0 = arith.constant 0 : i32
    %c0_i32_1 = arith.constant 0 : i32
    return %c0_i32, %c0_i32_0 : i32, i32
  }
  func.func @transform_8(%arg0: i32) -> (i32, i32) {
    %c0_i32 = arith.constant 0 : i32
    %c0_i32_0 = arith.constant 0 : i32
    %c0_i32_1 = arith.constant 0 : i32
    return %c0_i32, %c0_i32_0 : i32, i32
  }
  func.func @transform_9(%arg0: i32) -> (i32, i32) {
    %c0_i32 = arith.constant 0 : i32
    %c0_i32_0 = arith.constant 0 : i32
    return %arg0, %c0_i32 : i32, i32
  }
  func.func @transform_10(%arg0: i32) -> (i32, i32) {
    %c0_i32 = arith.constant 0 : i32
    %c0_i32_0 = arith.constant 0 : i32
    return %arg0, %c0_i32 : i32, i32
  }
}

module attributes {stable_mosaic.version = 11 : i64} {
  func.func @_cvp_kernel(%arg0: i32, %arg1: memref<8x256xf32, #tpu.memory_space<vmem>>, %arg2: memref<256x256xbf16, #tpu.memory_space<vmem>>, %arg3: memref<1x256xf32, #tpu.memory_space<vmem>>, %arg4: memref<256x256xbf16, #tpu.memory_space<vmem>>, %arg5: memref<1x256xf32, #tpu.memory_space<vmem>>, %arg6: memref<256x256xbf16, #tpu.memory_space<vmem>>, %arg7: memref<1x256xf32, #tpu.memory_space<vmem>>, %arg8: memref<256x256xbf16, #tpu.memory_space<vmem>>, %arg9: memref<1x256xf32, #tpu.memory_space<vmem>>, %arg10: memref<8x256xf32, #tpu.memory_space<vmem>>, %arg11: memref<8x256xf32, #tpu.memory_space<vmem>>) attributes {dimension_semantics = [#tpu.dimension_semantics<parallel>], iteration_bounds = array<i64: 1>, scalar_prefetch = 0 : i64, scratch_operands = 0 : i64, tpu.core_type = #tpu.core_type<tc>, window_params = [{transform_indices = @transform_0, window_bounds = array<i64: 8, 256>}, {pipeline_mode = #tpu.pipeline_mode<synchronous>, transform_indices = @transform_1, window_bounds = array<i64: 256, 256>}, {pipeline_mode = #tpu.pipeline_mode<synchronous>, transform_indices = @transform_2, window_bounds = array<i64: 1, 256>}, {pipeline_mode = #tpu.pipeline_mode<synchronous>, transform_indices = @transform_3, window_bounds = array<i64: 256, 256>}, {pipeline_mode = #tpu.pipeline_mode<synchronous>, transform_indices = @transform_4, window_bounds = array<i64: 1, 256>}, {pipeline_mode = #tpu.pipeline_mode<synchronous>, transform_indices = @transform_5, window_bounds = array<i64: 256, 256>}, {pipeline_mode = #tpu.pipeline_mode<synchronous>, transform_indices = @transform_6, window_bounds = array<i64: 1, 256>}, {pipeline_mode = #tpu.pipeline_mode<synchronous>, transform_indices = @transform_7, window_bounds = array<i64: 256, 256>}, {pipeline_mode = #tpu.pipeline_mode<synchronous>, transform_indices = @transform_8, window_bounds = array<i64: 1, 256>}, {transform_indices = @transform_9, window_bounds = array<i64: 8, 256>}, {transform_indices = @transform_10, window_bounds = array<i64: 8, 256>}]} {
    %c0 = arith.constant 0 : index
    %c0_0 = arith.constant 0 : index
    %0 = vector.load %arg1[%c0, %c0_0] : memref<8x256xf32, #tpu.memory_space<vmem>>, vector<8x256xf32>
    %1 = arith.truncf %0 : vector<8x256xf32> to vector<8x256xbf16>
    %c0_1 = arith.constant 0 : index
    %c0_2 = arith.constant 0 : index
    %2 = vector.load %arg2[%c0_1, %c0_2] : memref<256x256xbf16, #tpu.memory_space<vmem>>, vector<256x256xbf16>
    %cst = arith.constant dense<0.000000e+00> : vector<8x256xf32>
    %3 = tpu.matmul %1, %2, %cst {dimension_numbers = #tpu.dot_dimension_numbers<[1], [0], [0], [1], [0, 0, 1, 1], [], []>} : vector<8x256xbf16>, vector<256x256xbf16>, vector<8x256xf32> -> vector<8x256xf32>
    %c0_3 = arith.constant 0 : index
    %c0_4 = arith.constant 0 : index
    %4 = vector.load %arg3[%c0_3, %c0_4] : memref<1x256xf32, #tpu.memory_space<vmem>>, vector<1x256xf32>
    %5 = vector.broadcast %4 : vector<1x256xf32> to vector<8x256xf32>
    %6 = arith.addf %3, %5 : vector<8x256xf32>
    %cst_5 = arith.constant 0.000000e+00 : f32
    %7 = vector.broadcast %cst_5 : f32 to vector<8x256xf32>
    %8 = arith.maximumf %6, %7 : vector<8x256xf32>
    %9 = arith.truncf %8 : vector<8x256xf32> to vector<8x256xbf16>
    %c0_6 = arith.constant 0 : index
    %c0_7 = arith.constant 0 : index
    %10 = vector.load %arg4[%c0_6, %c0_7] : memref<256x256xbf16, #tpu.memory_space<vmem>>, vector<256x256xbf16>
    %cst_8 = arith.constant dense<0.000000e+00> : vector<8x256xf32>
    %11 = tpu.matmul %9, %10, %cst_8 {dimension_numbers = #tpu.dot_dimension_numbers<[1], [0], [0], [1], [0, 0, 1, 1], [], []>} : vector<8x256xbf16>, vector<256x256xbf16>, vector<8x256xf32> -> vector<8x256xf32>
    %c0_9 = arith.constant 0 : index
    %c0_10 = arith.constant 0 : index
    %12 = vector.load %arg5[%c0_9, %c0_10] : memref<1x256xf32, #tpu.memory_space<vmem>>, vector<1x256xf32>
    %13 = vector.broadcast %12 : vector<1x256xf32> to vector<8x256xf32>
    %14 = arith.addf %11, %13 : vector<8x256xf32>
    %cst_11 = arith.constant 0.000000e+00 : f32
    %15 = vector.broadcast %cst_11 : f32 to vector<8x256xf32>
    %16 = arith.maximumf %14, %15 : vector<8x256xf32>
    %c0_12 = arith.constant 0 : index
    %c0_13 = arith.constant 0 : index
    %17 = vector.load %arg10[%c0_12, %c0_13] : memref<8x256xf32, #tpu.memory_space<vmem>>, vector<8x256xf32>
    tpu.vector_store %arg10[%c0_12, %c0_13], %16 {strides = array<i32>} : memref<8x256xf32, #tpu.memory_space<vmem>>, vector<8x256xf32>,
    %18 = arith.truncf %16 : vector<8x256xf32> to vector<8x256xbf16>
    %c0_14 = arith.constant 0 : index
    %c0_15 = arith.constant 0 : index
    %19 = vector.load %arg6[%c0_14, %c0_15] : memref<256x256xbf16, #tpu.memory_space<vmem>>, vector<256x256xbf16>
    %cst_16 = arith.constant dense<0.000000e+00> : vector<8x256xf32>
    %20 = tpu.matmul %18, %19, %cst_16 {dimension_numbers = #tpu.dot_dimension_numbers<[1], [0], [0], [1], [0, 0, 1, 1], [], []>} : vector<8x256xbf16>, vector<256x256xbf16>, vector<8x256xf32> -> vector<8x256xf32>
    %c0_17 = arith.constant 0 : index
    %c0_18 = arith.constant 0 : index
    %21 = vector.load %arg7[%c0_17, %c0_18] : memref<1x256xf32, #tpu.memory_space<vmem>>, vector<1x256xf32>
    %22 = vector.broadcast %21 : vector<1x256xf32> to vector<8x256xf32>
    %23 = arith.addf %20, %22 : vector<8x256xf32>
    %cst_19 = arith.constant 0.000000e+00 : f32
    %24 = vector.broadcast %cst_19 : f32 to vector<8x256xf32>
    %25 = arith.maximumf %23, %24 : vector<8x256xf32>
    %26 = arith.truncf %25 : vector<8x256xf32> to vector<8x256xbf16>
    %c0_20 = arith.constant 0 : index
    %c0_21 = arith.constant 0 : index
    %27 = vector.load %arg8[%c0_20, %c0_21] : memref<256x256xbf16, #tpu.memory_space<vmem>>, vector<256x256xbf16>
    %cst_22 = arith.constant dense<0.000000e+00> : vector<8x256xf32>
    %28 = tpu.matmul %26, %27, %cst_22 {dimension_numbers = #tpu.dot_dimension_numbers<[1], [0], [0], [1], [0, 0, 1, 1], [], []>} : vector<8x256xbf16>, vector<256x256xbf16>, vector<8x256xf32> -> vector<8x256xf32>
    %c0_23 = arith.constant 0 : index
    %c0_24 = arith.constant 0 : index
    %29 = vector.load %arg9[%c0_23, %c0_24] : memref<1x256xf32, #tpu.memory_space<vmem>>, vector<1x256xf32>
    %30 = vector.broadcast %29 : vector<1x256xf32> to vector<8x256xf32>
    %31 = arith.addf %28, %30 : vector<8x256xf32>
    %cst_25 = arith.constant 0.000000e+00 : f32
    %32 = vector.broadcast %cst_25 : f32 to vector<8x256xf32>
    %33 = arith.maximumf %31, %32 : vector<8x256xf32>
    %c0_26 = arith.constant 0 : index
    %c0_27 = arith.constant 0 : index
    %34 = vector.load %arg11[%c0_26, %c0_27] : memref<8x256xf32, #tpu.memory_space<vmem>>, vector<8x256xf32>
    tpu.vector_store %arg11[%c0_26, %c0_27], %33 {strides = array<i32>} : memref<8x256xf32, #tpu.memory_space<vmem>>, vector<8x256xf32>,
    return
  }
  func.func @transform_0(%arg0: i32) -> (i32, i32) {
    %c0_i32 = arith.constant 0 : i32
    %c0_i32_0 = arith.constant 0 : i32
    return %arg0, %c0_i32 : i32, i32
  }
  func.func @transform_1(%arg0: i32) -> (i32, i32) {
    %c0_i32 = arith.constant 0 : i32
    %c0_i32_0 = arith.constant 0 : i32
    %c0_i32_1 = arith.constant 0 : i32
    return %c0_i32, %c0_i32_0 : i32, i32
  }
  func.func @transform_2(%arg0: i32) -> (i32, i32) {
    %c0_i32 = arith.constant 0 : i32
    %c0_i32_0 = arith.constant 0 : i32
    %c0_i32_1 = arith.constant 0 : i32
    return %c0_i32, %c0_i32_0 : i32, i32
  }
  func.func @transform_3(%arg0: i32) -> (i32, i32) {
    %c0_i32 = arith.constant 0 : i32
    %c0_i32_0 = arith.constant 0 : i32
    %c0_i32_1 = arith.constant 0 : i32
    return %c0_i32, %c0_i32_0 : i32, i32
  }
  func.func @transform_4(%arg0: i32) -> (i32, i32) {
    %c0_i32 = arith.constant 0 : i32
    %c0_i32_0 = arith.constant 0 : i32
    %c0_i32_1 = arith.constant 0 : i32
    return %c0_i32, %c0_i32_0 : i32, i32
  }
  func.func @transform_5(%arg0: i32) -> (i32, i32) {
    %c0_i32 = arith.constant 0 : i32
    %c0_i32_0 = arith.constant 0 : i32
    %c0_i32_1 = arith.constant 0 : i32
    return %c0_i32, %c0_i32_0 : i32, i32
  }
  func.func @transform_6(%arg0: i32) -> (i32, i32) {
    %c0_i32 = arith.constant 0 : i32
    %c0_i32_0 = arith.constant 0 : i32
    %c0_i32_1 = arith.constant 0 : i32
    return %c0_i32, %c0_i32_0 : i32, i32
  }
  func.func @transform_7(%arg0: i32) -> (i32, i32) {
    %c0_i32 = arith.constant 0 : i32
    %c0_i32_0 = arith.constant 0 : i32
    %c0_i32_1 = arith.constant 0 : i32
    return %c0_i32, %c0_i32_0 : i32, i32
  }
  func.func @transform_8(%arg0: i32) -> (i32, i32) {
    %c0_i32 = arith.constant 0 : i32
    %c0_i32_0 = arith.constant 0 : i32
    %c0_i32_1 = arith.constant 0 : i32
    return %c0_i32, %c0_i32_0 : i32, i32
  }
  func.func @transform_9(%arg0: i32) -> (i32, i32) {
    %c0_i32 = arith.constant 0 : i32
    %c0_i32_0 = arith.constant 0 : i32
    return %arg0, %c0_i32 : i32, i32
  }
  func.func @transform_10(%arg0: i32) -> (i32, i32) {
    %c0_i32 = arith.constant 0 : i32
    %c0_i32_0 = arith.constant 0 : i32
    return %arg0, %c0_i32 : i32, i32
  }
}

module attributes {stable_mosaic.version = 11 : i64} {
  func.func @_tiled_linear_relu_kernel(%arg0: i32, %arg1: i32, %arg2: i32, %arg3: memref<8x256xf32, #tpu.memory_space<vmem>>, %arg4: memref<256x256xbf16, #tpu.memory_space<vmem>>, %arg5: memref<1x256xf32, #tpu.memory_space<vmem>>, %arg6: memref<8x256xf32, #tpu.memory_space<vmem>>, %arg7: memref<8x256xf32, #tpu.memory_space<vmem>>) attributes {dimension_semantics = [#tpu.dimension_semantics<parallel>, #tpu.dimension_semantics<parallel>, #tpu.dimension_semantics<arbitrary>], iteration_bounds = array<i64: 1, 1, 1>, scalar_prefetch = 0 : i64, scratch_operands = 1 : i64, tpu.core_type = #tpu.core_type<tc>, window_params = [{transform_indices = @transform_0, window_bounds = array<i64: 8, 256>}, {transform_indices = @transform_1, window_bounds = array<i64: 256, 256>}, {transform_indices = @transform_2, window_bounds = array<i64: 1, 256>}, {transform_indices = @transform_3, window_bounds = array<i64: 8, 256>}]} {
    %c0_i32 = arith.constant 0 : i32
    %0 = arith.cmpi eq, %arg2, %c0_i32 : i32
    %1 = arith.extui %0 : i1 to i32
    %c0_i32_0 = arith.constant 0 : i32
    %2 = arith.cmpi ne, %1, %c0_i32_0 : i32
    scf.if %2 {
      %cst_10 = arith.constant 0.000000e+00 : f32
      %13 = vector.broadcast %cst_10 : f32 to vector<8x256xf32>
      %c0_11 = arith.constant 0 : index
      %c0_12 = arith.constant 0 : index
      %14 = vector.load %arg7[%c0_11, %c0_12] : memref<8x256xf32, #tpu.memory_space<vmem>>, vector<8x256xf32>
      tpu.vector_store %arg7[%c0_11, %c0_12], %13 {strides = array<i32>} : memref<8x256xf32, #tpu.memory_space<vmem>>, vector<8x256xf32>,
    } else {
    }
    %c0 = arith.constant 0 : index
    %c0_1 = arith.constant 0 : index
    %3 = vector.load %arg7[%c0, %c0_1] : memref<8x256xf32, #tpu.memory_space<vmem>>, vector<8x256xf32>
    %c0_2 = arith.constant 0 : index
    %c0_3 = arith.constant 0 : index
    %4 = vector.load %arg3[%c0_2, %c0_3] : memref<8x256xf32, #tpu.memory_space<vmem>>, vector<8x256xf32>
    %5 = arith.truncf %4 : vector<8x256xf32> to vector<8x256xbf16>
    %c0_4 = arith.constant 0 : index
    %c0_5 = arith.constant 0 : index
    %6 = vector.load %arg4[%c0_4, %c0_5] : memref<256x256xbf16, #tpu.memory_space<vmem>>, vector<256x256xbf16>
    %cst = arith.constant dense<0.000000e+00> : vector<8x256xf32>
    %7 = tpu.matmul %5, %6, %cst {dimension_numbers = #tpu.dot_dimension_numbers<[1], [0], [0], [1], [0, 0, 1, 1], [], []>} : vector<8x256xbf16>, vector<256x256xbf16>, vector<8x256xf32> -> vector<8x256xf32>
    %8 = arith.addf %3, %7 : vector<8x256xf32>
    %c0_6 = arith.constant 0 : index
    %c0_7 = arith.constant 0 : index
    %9 = vector.load %arg7[%c0_6, %c0_7] : memref<8x256xf32, #tpu.memory_space<vmem>>, vector<8x256xf32>
    tpu.vector_store %arg7[%c0_6, %c0_7], %8 {strides = array<i32>} : memref<8x256xf32, #tpu.memory_space<vmem>>, vector<8x256xf32>,
    %c0_i32_8 = arith.constant 0 : i32
    %10 = arith.cmpi eq, %arg2, %c0_i32_8 : i32
    %11 = arith.extui %10 : i1 to i32
    %c0_i32_9 = arith.constant 0 : i32
    %12 = arith.cmpi ne, %11, %c0_i32_9 : i32
    scf.if %12 {
      %c0_10 = arith.constant 0 : index
      %c0_11 = arith.constant 0 : index
      %13 = vector.load %arg7[%c0_10, %c0_11] : memref<8x256xf32, #tpu.memory_space<vmem>>, vector<8x256xf32>
      %c0_12 = arith.constant 0 : index
      %c0_13 = arith.constant 0 : index
      %14 = vector.load %arg5[%c0_12, %c0_13] : memref<1x256xf32, #tpu.memory_space<vmem>>, vector<1x256xf32>
      %15 = vector.broadcast %14 : vector<1x256xf32> to vector<8x256xf32>
      %16 = arith.addf %13, %15 : vector<8x256xf32>
      %cst_14 = arith.constant 0.000000e+00 : f32
      %17 = vector.broadcast %cst_14 : f32 to vector<8x256xf32>
      %18 = arith.maximumf %16, %17 : vector<8x256xf32>
      %c0_15 = arith.constant 0 : index
      %c0_16 = arith.constant 0 : index
      %19 = vector.load %arg6[%c0_15, %c0_16] : memref<8x256xf32, #tpu.memory_space<vmem>>, vector<8x256xf32>
      tpu.vector_store %arg6[%c0_15, %c0_16], %18 {strides = array<i32>} : memref<8x256xf32, #tpu.memory_space<vmem>>, vector<8x256xf32>,
    } else {
    }
    return
  }
  func.func @transform_0(%arg0: i32, %arg1: i32, %arg2: i32) -> (i32, i32) {
    %c0_i32 = arith.constant 0 : i32
    return %arg0, %arg2 : i32, i32
  }
  func.func @transform_1(%arg0: i32, %arg1: i32, %arg2: i32) -> (i32, i32) {
    %c0_i32 = arith.constant 0 : i32
    return %arg2, %arg1 : i32, i32
  }
  func.func @transform_2(%arg0: i32, %arg1: i32, %arg2: i32) -> (i32, i32) {
    %c0_i32 = arith.constant 0 : i32
    %c0_i32_0 = arith.constant 0 : i32
    return %c0_i32, %arg1 : i32, i32
  }
  func.func @transform_3(%arg0: i32, %arg1: i32, %arg2: i32) -> (i32, i32) {
    %c0_i32 = arith.constant 0 : i32
    return %arg0, %arg1 : i32, i32
  }
}

</mosaic_0001>

<bundles_post_ra>
// kernel: _fused_mlp2.1
= control target key start
LH: loop header
LB: loop body
LE: loop exit
PB: predicated region body
PF: predicated region fallthrough
CT: control target
= control target key end

     0   :  { %16 = vsyncpa [#allocation3], 0  ;;  %s2148_s0 = inlined_call_operand.hbm [shape: f32[8,256], index: 0, kind: input, shape index: {}]   ;;  %s2149_s1 = inlined_call_operand.hbm [shape: bf16[256,256], index: 1, kind: input, shape index: {}]   ;;  %s2150_s2 = inlined_call_operand.hbm [shape: f32[1,256], index: 2, kind: input, shape index: {}]   ;;  %s2151_s3 = inlined_call_operand.hbm [shape: bf16[256,256], index: 3, kind: input, shape index: {}]   ;;  %s2152_s4 = inlined_call_operand.vmem [shape: f32[1,256], index: 4, kind: input, shape index: {}]   ;;  %s2153_s5 = inlined_call_operand.hbm [shape: bf16[256,256], index: 5, kind: input, shape index: {}]   ;;  %s2154_s6 = inlined_call_operand.vmem [shape: f32[1,256], index: 6, kind: input, shape index: {}]   ;;  %s2155_s7 = inlined_call_operand.hbm [shape: bf16[256,256], index: 7, kind: input, shape index: {}]   ;;  %s2156_s8 = inlined_call_operand.vmem [shape: f32[1,256], index: 8, kind: input, shape index: {}]   ;;  %s2157_s9 = inlined_call_operand.hbm [shape: f32[8,256], index: 9, kind: output, shape index: {0}]   ;;  %s2158_s10 = inlined_call_operand.hbm [shape: f32[8,256], index: 10, kind: output, shape index: {1}]  }
   0x1   :  { %17 = vsyncpa [#allocation6], 0 }
   0x2   :  { %18 = vsyncpa [#allocation9], 0 }
   0x3   :  { %19 = vsyncpa [#allocation12], 0 }
   0x4   :  { %20 = vsyncpa [#allocation4], 0  ;;  %s37_s15 = sshll.u32 %s2149_s1, 4  ;;  %s38_s15 = int_to_ptr.hbm [resolvable:$true] %s37_s15 }
   0x5   :  { %21 = vsyncpa [#allocation15], 0  ;;  %s2038_s16 = smov [#allocation5]   ;;  %s61_s20 = sshll.u32 %s2151_s3, 4  ;;  %s62_s20 = int_to_ptr.hbm [resolvable:$true] %s61_s20 }
   0x6   :  { %s39_s17 = sshll.u32 %s2038_s16, 4  ;;  %s2039_s21 = smov 128   ;;  %s40_s17 = int_to_ptr.vmem [resolvable:$true] %s39_s17 }
   0x7   :  { %s2040_s22 = smov 8   ;;  %s2041_s23 = smov [#allocation8]  }
   0x8   :  { %45 = dma.hbm_to_vmem [thread:$0]  %s38_s15, 4096, %s40_s17, [#allocation6], %s2039_s21, %s2039_s21, %s2040_s22  }
   0x9   :  { %s63_s24 = sshll.u32 %s2041_s23, 4  ;;  %s27_s26 = sshll.u32 %s2148_s0, 4  ;;  %s64_s24 = int_to_ptr.vmem [resolvable:$true] %s63_s24  ;;  %s28_s26 = int_to_ptr.hbm [resolvable:$true] %s27_s26 }
   0xa   :  { %69 = dma.hbm_to_vmem [thread:$0]  %s62_s20, 4096, %s64_s24, [#allocation9], %s2039_s21, %s2039_s21, %s2040_s22  }
   0xb   :  { %s51_s28 = sshll.u32 %s2150_s2, 4  ;;  %s2042_s29 = smov [#allocation2]   ;;  %s52_s28 = int_to_ptr.hbm [resolvable:$true] %s51_s28 }
   0xc   :  { %s29_s30 = sshll.u32 %s2042_s29, 4  ;;  %s2043_s11 = smov [#allocation7]   ;;  %s30_s30 = int_to_ptr.vmem [resolvable:$true] %s29_s30 }
   0xd   :  { %32 = dma.hbm_to_vmem [thread:$0]  %s28_s26, 256, %s30_s30, [#allocation3]  }
   0xe   :  { %s53_s12 = sshll.u32 %s2043_s11, 4  ;;  %s76_s0 = sshll.u32 %s2153_s5, 4  ;;  %s54_s12 = int_to_ptr.vmem [resolvable:$true] %s53_s12  ;;  %s77_s0 = int_to_ptr.hbm [resolvable:$true] %s76_s0 }
   0xf   :  { %56 = dma.hbm_to_vmem [thread:$0]  %s52_s28, 32, %s54_s12, [#allocation6]  }
  0x10   :  { %s91_s17 = sshll.u32 %s2155_s7, 4  ;;  %s2044_s18 = smov [#allocation10]   ;;  %s92_s17 = int_to_ptr.hbm [resolvable:$true] %s91_s17 }
  0x11   :  { %s78_s2 = sshll.u32 %s2044_s18, 4  ;;  %s2045_s19 = smov [#allocation11]   ;;  %s79_s2 = int_to_ptr.vmem [resolvable:$true] %s78_s2 }
  0x12   :  { %84 = dma.hbm_to_vmem [thread:$0]  %s77_s0, 4096, %s79_s2, [#allocation9], %s2039_s21, %s2039_s21, %s2040_s22  }
  0x13   :  { %s93_s20 = sshll.u32 %s2045_s19, 4  ;;  %s94_s20 = int_to_ptr.vmem [resolvable:$true] %s93_s20 }
  0x14   :  { %99 = dma.hbm_to_vmem [thread:$0]  %s92_s17, 4096, %s94_s20, [#allocation12], %s2039_s21, %s2039_s21, %s2040_s22  }
  0x15   :  { %2026 = dma.done.wait [#allocation3], 256  }
  0x16   :  { %2027 = vsyncadd [#allocation3], 4294967040 }
  0x17   :  { %2028 = dma.done.wait [#allocation6], 4128  }
  0x18   :  { %2029 = vsyncadd [#allocation6], 4294963168 }
  0x19   :  { %2030 = dma.done.wait [#allocation9], 8192  }
  0x1a   :  { %2031 = vsyncadd [#allocation9], 4294959104 }
  0x1b   :  { %2032 = dma.done.wait [#allocation12], 4096  }
  0x1c   :  { %2033 = vsyncadd [#allocation12], 4294963200  ;;  %v1242_v0 = vld [vmem:[#allocation5 + $0x70] sm:$0xf]  ;;  %v1711_v1 = vld [vmem:[#allocation5 + $0x74] sm:$0xf0] }
  0x1d   :  { %v1306_v2 = vld [vmem:[#allocation5 + $0xf0] sm:$0xf]  ;;  %v1243_v3 = vor.u32 %v1711_v1, %v1242_v0  ;;  %v1727_v4 = vld [vmem:[#allocation5 + $0xf4] sm:$0xf0]  ;;  %v1710_v5 = vld [vmem:[#allocation5 + $0x74] sm:$0xf] }
  0x1e   :  { %v1244_v6 = vld [vmem:[#allocation5 + $0x78] sm:$0xf0]  ;;  %v1307_v7 = vor.u32 %v1727_v4, %v1306_v2  ;;  %v1726_v9 = vld [vmem:[#allocation5 + $0xf4] sm:$0xf]  ;;  %v1234_v11 = vld [vmem:[#allocation5 + $0x60] sm:$0xf] }
  0x1f   :  { %v1247_v8 = vor.u32 %v1710_v5, %v1244_v6  ;;  %v1308_v10 = vld [vmem:[#allocation5 + $0xf8] sm:$0xf0]  ;;  %328 = vmatpush.bf16.msra.mxu0 %v1243_v3  ;;  %v1709_v13 = vld [vmem:[#allocation5 + $0x64] sm:$0xf0]  ;;  %v1298_v14 = vld [vmem:[#allocation5 + $0xe0] sm:$0xf] }
  0x20   :  { %v1311_v12 = vor.u32 %v1726_v9, %v1308_v10  ;;  %v1725_v15 = vld [vmem:[#allocation5 + $0xe4] sm:$0xf0]  ;;  %341 = vmatpush.bf16.msra.mxu1 %v1307_v7  ;;  %v1235_v16 = vor.u32 %v1709_v13, %v1234_v11  ;;  %v1708_v18 = vld [vmem:[#allocation5 + $0x64] sm:$0xf]  ;;  %v1236_v19 = vld [vmem:[#allocation5 + $0x68] sm:$0xf0] }
  0x21   :  { %354 = vmatpush.bf16.msra.mxu2 %v1247_v8  ;;  %v1299_v17 = vor.u32 %v1725_v15, %v1298_v14  ;;  %v1724_v20 = vld [vmem:[#allocation5 + $0xe4] sm:$0xf]  ;;  %v1239_v21 = vor.u32 %v1708_v18, %v1236_v19  ;;  %v1300_v22 = vld [vmem:[#allocation5 + $0xe8] sm:$0xf0]  ;;  %v1226_v23 = vld [vmem:[#allocation5 + $0x50] sm:$0xf] }
  0x22   :  { %367 = vmatpush.bf16.msra.mxu3 %v1311_v12  ;;  %v1707_v24 = vld [vmem:[#allocation5 + $0x54] sm:$0xf0]  ;;  %v1303_v25 = vor.u32 %v1724_v20, %v1300_v22  ;;  %v1290_v26 = vld [vmem:[#allocation5 + $0xd0] sm:$0xf]  ;;  %v1706_v28 = vld [vmem:[#allocation5 + $0x54] sm:$0xf] }
  0x23   :  { %v1723_v27 = vld [vmem:[#allocation5 + $0xd4] sm:$0xf0]  ;;  %329 = vmatpush.bf16.msra.mxu0 %v1235_v16  ;;  %v1227_v29 = vor.u32 %v1707_v24, %v1226_v23  ;;  %v1228_v30 = vld [vmem:[#allocation5 + $0x58] sm:$0xf0]  ;;  %v1722_v31 = vld [vmem:[#allocation5 + $0xd4] sm:$0xf] }
  0x24   :  { %v1292_v32 = vld [vmem:[#allocation5 + $0xd8] sm:$0xf0]  ;;  %342 = vmatpush.bf16.msra.mxu1 %v1299_v17  ;;  %v1291_v33 = vor.u32 %v1723_v27, %v1290_v26  ;;  %v1231_v34 = vor.u32 %v1706_v28, %v1228_v30  ;;  %v1218_v35 = vld [vmem:[#allocation5 + $0x40] sm:$0xf]  ;;  %v1705_v36 = vld [vmem:[#allocation5 + $0x44] sm:$0xf0] }
  0x25   :  { %355 = vmatpush.bf16.msra.mxu2 %v1239_v21  ;;  %v1282_v37 = vld [vmem:[#allocation5 + $0xc0] sm:$0xf]  ;;  %v1295_v38 = vor.u32 %v1722_v31, %v1292_v32  ;;  %v1721_v39 = vld [vmem:[#allocation5 + $0xc4] sm:$0xf0]  ;;  %v1704_v40 = vld [vmem:[#allocation5 + $0x44] sm:$0xf]  ;;  %v1219_v44 = vor.u32 %v1705_v36, %v1218_v35 }
  0x26   :  { %368 = vmatpush.bf16.msra.mxu3 %v1303_v25  ;;  %v1220_v41 = vld [vmem:[#allocation5 + $0x48] sm:$0xf0]  ;;  %v1720_v42 = vld [vmem:[#allocation5 + $0xc4] sm:$0xf]  ;;  %v1283_v45 = vor.u32 %v1721_v39, %v1282_v37  ;;  %v1210_v47 = vld [vmem:[#allocation5 + $0x30] sm:$0xf] }
  0x27   :  { %v1284_v43 = vld [vmem:[#allocation5 + $0xc8] sm:$0xf0]  ;;  %330 = vmatpush.bf16.msra.mxu0 %v1227_v29  ;;  %v1223_v46 = vor.u32 %v1704_v40, %v1220_v41  ;;  %v1703_v48 = vld [vmem:[#allocation5 + $0x34] sm:$0xf0]  ;;  %v1274_v49 = vld [vmem:[#allocation5 + $0xb0] sm:$0xf] }
  0x28   :  { %343 = vmatpush.bf16.msra.mxu1 %v1291_v33  ;;  %v1287_v50 = vor.u32 %v1720_v42, %v1284_v43  ;;  %v1719_v51 = vld [vmem:[#allocation5 + $0xb4] sm:$0xf0]  ;;  %v1702_v52 = vld [vmem:[#allocation5 + $0x34] sm:$0xf]  ;;  %v1212_v53 = vld [vmem:[#allocation5 + $0x38] sm:$0xf0]  ;;  %v1211_v56 = vor.u32 %v1703_v48, %v1210_v47 }
  0x29   :  { %356 = vmatpush.bf16.msra.mxu2 %v1231_v34  ;;  %v1718_v54 = vld [vmem:[#allocation5 + $0xb4] sm:$0xf]  ;;  %v1276_v55 = vld [vmem:[#allocation5 + $0xb8] sm:$0xf0]  ;;  %v1275_v57 = vor.u32 %v1719_v51, %v1274_v49  ;;  %v1215_v58 = vor.u32 %v1702_v52, %v1212_v53  ;;  %v1202_v59 = vld [vmem:[#allocation5 + $0x20] sm:$0xf] }
  0x2a   :  { %369 = vmatpush.bf16.msra.mxu3 %v1295_v38  ;;  %v1701_v60 = vld [vmem:[#allocation5 + $0x24] sm:$0xf0]  ;;  %v1266_v61 = vld [vmem:[#allocation5 + $0xa0] sm:$0xf]  ;;  %v1279_v62 = vor.u32 %v1718_v54, %v1276_v55  ;;  %v1700_v0 = vld [vmem:[#allocation5 + $0x24] sm:$0xf] }
  0x2b   :  { %331 = vmatpush.bf16.msra.mxu0 %v1219_v44  ;;  %v1717_v63 = vld [vmem:[#allocation5 + $0xa4] sm:$0xf0]  ;;  %v1204_v1 = vld [vmem:[#allocation5 + $0x28] sm:$0xf0]  ;;  %v1716_v2 = vld [vmem:[#allocation5 + $0xa4] sm:$0xf]  ;;  %v1203_v4 = vor.u32 %v1701_v60, %v1202_v59 }
  0x2c   :  { %344 = vmatpush.bf16.msra.mxu1 %v1283_v45  ;;  %v1268_v3 = vld [vmem:[#allocation5 + $0xa8] sm:$0xf0]  ;;  %v1267_v5 = vor.u32 %v1717_v63, %v1266_v61  ;;  %v1207_v6 = vor.u32 %v1700_v0, %v1204_v1  ;;  %v1194_v7 = vld [vmem:[#allocation5 + $0x10] sm:$0xf]  ;;  %v1699_v8 = vld [vmem:[#allocation5 + $0x14] sm:$0xf0] }
  0x2d   :  { %357 = vmatpush.bf16.msra.mxu2 %v1223_v46  ;;  %v1258_v9 = vld [vmem:[#allocation5 + $0x90] sm:$0xf]  ;;  %v1271_v10 = vor.u32 %v1716_v2, %v1268_v3  ;;  %v1715_v11 = vld [vmem:[#allocation5 + $0x94] sm:$0xf0]  ;;  %v1698_v12 = vld [vmem:[#allocation5 + $0x14] sm:$0xf]  ;;  %v1195_v16 = vor.u32 %v1699_v8, %v1194_v7 }
  0x2e   :  { %370 = vmatpush.bf16.msra.mxu3 %v1287_v50  ;;  %v1196_v13 = vld [vmem:[#allocation5 + $0x18] sm:$0xf0]  ;;  %v1714_v14 = vld [vmem:[#allocation5 + $0x94] sm:$0xf]  ;;  %v1186_v17 = vld [vmem:[#allocation5] sm:$0xf]  ;;  %v1259_v18 = vor.u32 %v1715_v11, %v1258_v9 }
  0x2f   :  { %332 = vmatpush.bf16.msra.mxu0 %v1211_v56  ;;  %v1260_v15 = vld [vmem:[#allocation5 + $0x98] sm:$0xf0]  ;;  %v1199_v19 = vor.u32 %v1698_v12, %v1196_v13  ;;  %v1697_v20 = vld [vmem:[#allocation5 + $0x4] sm:$0xf0]  ;;  %v1250_v21 = vld [vmem:[#allocation5 + $0x80] sm:$0xf] }
  0x30   :  { %345 = vmatpush.bf16.msra.mxu1 %v1275_v57  ;;  %v1713_v22 = vld [vmem:[#allocation5 + $0x84] sm:$0xf0]  ;;  %v1263_v23 = vor.u32 %v1714_v14, %v1260_v15  ;;  %v1696_v24 = vld [vmem:[#allocation5 + $0x4] sm:$0xf]  ;;  %v1188_v25 = vld [vmem:[#allocation5 + $0x8] sm:$0xf0]  ;;  %v1187_v30 = vor.u32 %v1697_v20, %v1186_v17 }
  0x31   :  { %358 = vmatpush.bf16.msra.mxu2 %v1215_v58  ;;  %v1712_v26 = vld [vmem:[#allocation5 + $0x84] sm:$0xf]  ;;  %v1252_v27 = vld [vmem:[#allocation5 + $0x88] sm:$0xf0]  ;;  %v1370_v28 = vld [vmem:[#allocation8 + $0x70] sm:$0xf]  ;;  %v1251_v34 = vor.u32 %v1713_v22, %v1250_v21  ;;  %v1191_v35 = vor.u32 %v1696_v24, %v1188_v25 }
  0x32   :  { %371 = vmatpush.bf16.msra.mxu3 %v1279_v62  ;;  %v1743_v29 = vld [vmem:[#allocation8 + $0x74] sm:$0xf0]  ;;  %v126_v31 = vld [vmem:[#allocation2] sm:$0xff]  ;;  %v1372_v33 = vld [vmem:[#allocation8 + $0x78] sm:$0xf0]  ;;  %v1255_v37 = vor.u32 %v1712_v26, %v1252_v27  ;;  %s1155_s25 = sshll.u32 %s2157_s9, 4  ;;  %s1156_s25 = int_to_ptr.hbm [resolvable:$true] %s1155_s25 }
  0x33   :  { %333 = vmatpush.bf16.msra.mxu0 %v1203_v4  ;;  %v1742_v32 = vld [vmem:[#allocation8 + $0x74] sm:$0xf]  ;;  %v1371_v38 = vor.u32 %v1743_v29, %v1370_v28  ;;  %v1362_v39 = vld [vmem:[#allocation8 + $0x60] sm:$0xf]  ;;  %v1434_v40 = vld [vmem:[#allocation8 + $0xf0] sm:$0xf]  ;;  %v128_v42 = vpack.c.bf16 %v126_v31, %v126_v31 }
  0x34   :  { %346 = vmatpush.bf16.msra.mxu1 %v1267_v5  ;;  %v127_v36 = vld [vmem:[#allocation2 + $0x8] sm:$0xff]  ;;  %v1375_v43 = vor.u32 %v1742_v32, %v1372_v33  ;;  %v1741_v44 = vld [vmem:[#allocation8 + $0x64] sm:$0xf0]  ;;  %v1740_v48 = vld [vmem:[#allocation8 + $0x64] sm:$0xf]  ;;  %s2047_s9 = smov [#allocation14]  }
  0x35   :  { %359 = vmatpush.bf16.msra.mxu2 %v1207_v6  ;;  %v1759_v41 = vld [vmem:[#allocation8 + $0xf4] sm:$0xf0]  ;;  %v1758_v45 = vld [vmem:[#allocation8 + $0xf4] sm:$0xf]  ;;  %v1436_v46 = vld [vmem:[#allocation8 + $0xf8] sm:$0xf0]  ;;  %v129_v47 = vpack.c.bf16 %v127_v36, %v127_v36  ;;  %v1363_v51 = vor.u32 %v1741_v44, %v1362_v39 }
  0x36   :  { %372 = vmatpush.bf16.msra.mxu3 %v1271_v10  ;;  %v1364_v49 = vld [vmem:[#allocation8 + $0x68] sm:$0xf0]  ;;  %v1435_v50 = vor.u32 %v1759_v41, %v1434_v40  ;;  %v1439_v52 = vor.u32 %v1758_v45, %v1436_v46  ;;  %v1354_v53 = vld [vmem:[#allocation8 + $0x50] sm:$0xf]  ;;  %v1426_v54 = vld [vmem:[#allocation8 + $0xe0] sm:$0xf] }
  0x37   :  { %334 = vmatpush.bf16.msra.mxu0 %v1195_v16  ;;  %v1757_v55 = vld [vmem:[#allocation8 + $0xe4] sm:$0xf0]  ;;  %v1367_v56 = vor.u32 %v1740_v48, %v1364_v49  ;;  %v1739_v57 = vld [vmem:[#allocation8 + $0x54] sm:$0xf0]  ;;  %v1756_v58 = vld [vmem:[#allocation8 + $0xe4] sm:$0xf] }
  0x38   :  { %347 = vmatpush.bf16.msra.mxu1 %v1259_v18  ;;  %v1428_v59 = vld [vmem:[#allocation8 + $0xe8] sm:$0xf0]  ;;  %v1738_v60 = vld [vmem:[#allocation8 + $0x54] sm:$0xf]  ;;  %v1356_v61 = vld [vmem:[#allocation8 + $0x58] sm:$0xf0]  ;;  %v1427_v62 = vor.u32 %v1757_v55, %v1426_v54  ;;  %v1355_v63 = vor.u32 %v1739_v57, %v1354_v53 }
  0x39   :  { %360 = vmatpush.bf16.msra.mxu2 %v1199_v19  ;;  %v1431_v0 = vor.u32 %v1756_v58, %v1428_v59  ;;  %v1346_v1 = vld [vmem:[#allocation8 + $0x40] sm:$0xf]  ;;  %v1418_v2 = vld [vmem:[#allocation8 + $0xd0] sm:$0xf]  ;;  %v1755_v3 = vld [vmem:[#allocation8 + $0xd4] sm:$0xf0]  ;;  %v1359_v4 = vor.u32 %v1738_v60, %v1356_v61 }
  0x3a   :  { %373 = vmatpush.bf16.msra.mxu3 %v1263_v23  ;;  %v1737_v5 = vld [vmem:[#allocation8 + $0x44] sm:$0xf0]  ;;  %v1754_v6 = vld [vmem:[#allocation8 + $0xd4] sm:$0xf]  ;;  %v1420_v7 = vld [vmem:[#allocation8 + $0xd8] sm:$0xf0]  ;;  %v1419_v10 = vor.u32 %v1755_v3, %v1418_v2 }
  0x3b   :  { %335 = vmatpush.bf16.msra.mxu0 %v1187_v30  ;;  %v1736_v8 = vld [vmem:[#allocation8 + $0x44] sm:$0xf]  ;;  %v1348_v9 = vld [vmem:[#allocation8 + $0x48] sm:$0xf0]  ;;  %v1347_v11 = vor.u32 %v1737_v5, %v1346_v1  ;;  %v1423_v12 = vor.u32 %v1754_v6, %v1420_v7  ;;  %v1338_v13 = vld [vmem:[#allocation8 + $0x30] sm:$0xf] }
  0x3c   :  { %348 = vmatpush.bf16.msra.mxu1 %v1251_v34  ;;  %v1410_v14 = vld [vmem:[#allocation8 + $0xc0] sm:$0xf]  ;;  %v1753_v15 = vld [vmem:[#allocation8 + $0xc4] sm:$0xf0]  ;;  %v1351_v16 = vor.u32 %v1736_v8, %v1348_v9  ;;  %v1735_v17 = vld [vmem:[#allocation8 + $0x34] sm:$0xf0] }
  0x3d   :  { %361 = vmatpush.bf16.msra.mxu2 %v1191_v35  ;;  %v1752_v18 = vld [vmem:[#allocation8 + $0xc4] sm:$0xf]  ;;  %v1412_v19 = vld [vmem:[#allocation8 + $0xc8] sm:$0xf0]  ;;  %v1734_v20 = vld [vmem:[#allocation8 + $0x34] sm:$0xf]  ;;  %v1411_v22 = vor.u32 %v1753_v15, %v1410_v14  ;;  %v1339_v23 = vor.u32 %v1735_v17, %v1338_v13 }
  0x3e   :  { %374 = vmatpush.bf16.msra.mxu3 %v1255_v37  ;;  %336 = vmatmul.bf16.vlgmr.msra.gmra.mxu0 %v128_v42  ;;  %v1340_v21 = vld [vmem:[#allocation8 + $0x38] sm:$0xf0]  ;;  %v1415_v24 = vor.u32 %v1752_v18, %v1412_v19  ;;  %v1330_v26 = vld [vmem:[#allocation8 + $0x20] sm:$0xf]  ;;  %v1733_v27 = vld [vmem:[#allocation8 + $0x24] sm:$0xf0] }
  0x3f   :  { %582 = vmatpush.bf16.msrb.mxu0 %v1371_v38  ;;  %349 = vmatmul.bf16.vlgmr.msra.gmra.mxu1 %v129_v47  ;;  %v1343_v25 = vor.u32 %v1734_v20, %v1340_v21  ;;  %v1732_v28 = vld [vmem:[#allocation8 + $0x24] sm:$0xf]  ;;  %v1332_v29 = vld [vmem:[#allocation8 + $0x28] sm:$0xf0]  ;;  %v1331_v30 = vor.u32 %v1733_v27, %v1330_v26  ;;  %v1402_v32 = vld [vmem:[#allocation8 + $0xb0] sm:$0xf] }
  0x40   :  { %362 = vmatmul.bf16.vlgmr.msra.gmra.mxu2 %v128_v42  ;;  %595 = vmatpush.bf16.msrb.mxu1 %v1435_v50  ;;  %v1335_v31 = vor.u32 %v1732_v28, %v1332_v29  ;;  %v1751_v33 = vld [vmem:[#allocation8 + $0xb4] sm:$0xf0]  ;;  %v1750_v34 = vld [vmem:[#allocation8 + $0xb4] sm:$0xf]  ;;  %v1404_v36 = vld [vmem:[#allocation8 + $0xb8] sm:$0xf0] }
  0x41   :  { %608 = vmatpush.bf16.msrb.mxu2 %v1375_v43  ;;  %375 = vmatmul.bf16.vlgmr.msra.gmra.mxu3 %v129_v47  ;;  %v1403_v35 = vor.u32 %v1751_v33, %v1402_v32  ;;  %v1407_v37 = vor.u32 %v1750_v34, %v1404_v36  ;;  %v1322_v38 = vld [vmem:[#allocation8 + $0x10] sm:$0xf]  ;;  %v1731_v39 = vld [vmem:[#allocation8 + $0x14] sm:$0xf0]  ;;  %v1730_v40 = vld [vmem:[#allocation8 + $0x14] sm:$0xf] }
  0x42   :  { %621 = vmatpush.bf16.msrb.mxu3 %v1439_v52  ;;  %v1323_v41 = vor.u32 %v1731_v39, %v1322_v38  ;;  %v1324_v42 = vld [vmem:[#allocation8 + $0x18] sm:$0xf0]  ;;  %v1394_v44 = vld [vmem:[#allocation8 + $0xa0] sm:$0xf]  ;;  %v1749_v45 = vld [vmem:[#allocation8 + $0xa4] sm:$0xf0] }
  0x43   :  { %583 = vmatpush.bf16.msrb.mxu0 %v1363_v51  ;;  %v1327_v43 = vor.u32 %v1730_v40, %v1324_v42  ;;  %v1748_v46 = vld [vmem:[#allocation8 + $0xa4] sm:$0xf]  ;;  %v1395_v47 = vor.u32 %v1749_v45, %v1394_v44  ;;  %v1396_v48 = vld [vmem:[#allocation8 + $0xa8] sm:$0xf0]  ;;  %v1314_v50 = vld [vmem:[#allocation8] sm:$0xf] }
  0x44   :  { %596 = vmatpush.bf16.msrb.mxu1 %v1427_v62  ;;  %v1399_v49 = vor.u32 %v1748_v46, %v1396_v48  ;;  %v1729_v51 = vld [vmem:[#allocation8 + $0x4] sm:$0xf0]  ;;  %v1728_v52 = vld [vmem:[#allocation8 + $0x4] sm:$0xf]  ;;  %v1316_v54 = vld [vmem:[#allocation8 + $0x8] sm:$0xf0] }
  0x45   :  { %609 = vmatpush.bf16.msrb.mxu2 %v1367_v56  ;;  %v1315_v53 = vor.u32 %v1729_v51, %v1314_v50  ;;  %v1319_v55 = vor.u32 %v1728_v52, %v1316_v54  ;;  %v1386_v56 = vld [vmem:[#allocation8 + $0x90] sm:$0xf]  ;;  %v1747_v57 = vld [vmem:[#allocation8 + $0x94] sm:$0xf0]  ;;  %v1746_v59 = vld [vmem:[#allocation8 + $0x94] sm:$0xf] }
  0x46   :  { %622 = vmatpush.bf16.msrb.mxu3 %v1431_v0  ;;  %v1387_v58 = vor.u32 %v1747_v57, %v1386_v56  ;;  %v1388_v60 = vld [vmem:[#allocation8 + $0x98] sm:$0xf0]  ;;  %v1378_v62 = vld [vmem:[#allocation8 + $0x80] sm:$0xf]  ;;  %v1744_v0 = vld [vmem:[#allocation8 + $0x84] sm:$0xf] }
  0x47   :  { %584 = vmatpush.bf16.msrb.mxu0 %v1355_v63  ;;  %v1391_v61 = vor.u32 %v1746_v59, %v1388_v60  ;;  %v1745_v63 = vld [vmem:[#allocation8 + $0x84] sm:$0xf0]  ;;  %v1380_v2 = vld [vmem:[#allocation8 + $0x88] sm:$0xf0]  ;;  %v1775_v5 = vld [vmem:[#allocation10 + $0x74] sm:$0xf0] }
  0x48   :  { %597 = vmatpush.bf16.msrb.mxu1 %v1419_v10  ;;  %v1379_v1 = vor.u32 %v1745_v63, %v1378_v62  ;;  %v1383_v3 = vor.u32 %v1744_v0, %v1380_v2  ;;  %v1774_v6 = vld [vmem:[#allocation10 + $0x74] sm:$0xf]  ;;  %v1500_v8 = vld [vmem:[#allocation10 + $0x78] sm:$0xf0]  ;;  %v1490_v9 = vld [vmem:[#allocation10 + $0x60] sm:$0xf] }
  0x49   :  { %610 = vmatpush.bf16.msrb.mxu2 %v1359_v4  ;;  %v1498_v4 = vld [vmem:[#allocation10 + $0x70] sm:$0xf]  ;;  %v1773_v10 = vld [vmem:[#allocation10 + $0x64] sm:$0xf0]  ;;  %v1492_v13 = vld [vmem:[#allocation10 + $0x68] sm:$0xf0] }
  0x4a   :  { %623 = vmatpush.bf16.msrb.mxu3 %v1423_v12  ;;  %v1499_v7 = vor.u32 %v1775_v5, %v1498_v4  ;;  %v1772_v12 = vld [vmem:[#allocation10 + $0x64] sm:$0xf]  ;;  %v1562_v14 = vld [vmem:[#allocation10 + $0xf0] sm:$0xf]  ;;  %v1491_v15 = vor.u32 %v1773_v10, %v1490_v9  ;;  %v1790_v17 = vld [vmem:[#allocation10 + $0xf4] sm:$0xf] }
  0x4b   :  { %585 = vmatpush.bf16.msrb.mxu0 %v1347_v11  ;;  %v1503_v11 = vor.u32 %v1774_v6, %v1500_v8  ;;  %v1564_v18 = vld [vmem:[#allocation10 + $0xf8] sm:$0xf0]  ;;  %v1495_v19 = vor.u32 %v1772_v12, %v1492_v13  ;;  %v1554_v26 = vld [vmem:[#allocation10 + $0xe0] sm:$0xf]  ;;  %v1789_v27 = vld [vmem:[#allocation10 + $0xe4] sm:$0xf0] }
  0x4c   :  { %598 = vmatpush.bf16.msrb.mxu1 %v1411_v22  ;;  %v1567_v21 = vor.u32 %v1790_v17, %v1564_v18  ;;  %v1482_v22 = vld [vmem:[#allocation10 + $0x50] sm:$0xf]  ;;  %v1555_v28 = vor.u32 %v1789_v27, %v1554_v26  ;;  %v1788_v29 = vld [vmem:[#allocation10 + $0xe4] sm:$0xf]  ;;  %v1474_v33 = vld [vmem:[#allocation10 + $0x40] sm:$0xf] }
  0x4d   :  { %611 = vmatpush.bf16.msrb.mxu2 %v1351_v16  ;;  %v1791_v16 = vld [vmem:[#allocation10 + $0xf4] sm:$0xf0]  ;;  %v1769_v34 = vld [vmem:[#allocation10 + $0x44] sm:$0xf0]  ;;  %v1546_v36 = vld [vmem:[#allocation10 + $0xd0] sm:$0xf] }
  0x4e   :  { %624 = vmatpush.bf16.msrb.mxu3 %v1415_v24  ;;  %v1563_v20 = vor.u32 %v1791_v16, %v1562_v14  ;;  %v1770_v24 = vld [vmem:[#allocation10 + $0x54] sm:$0xf]  ;;  %v1768_v39 = vld [vmem:[#allocation10 + $0x44] sm:$0xf]  ;;  %v1476_v40 = vld [vmem:[#allocation10 + $0x48] sm:$0xf0]  ;;  %v1475_v45 = vor.u32 %v1769_v34, %v1474_v33 }
  0x4f   :  { %586 = vmatpush.bf16.msrb.mxu0 %v1339_v23  ;;  %v1771_v23 = vld [vmem:[#allocation10 + $0x54] sm:$0xf0]  ;;  %v1786_v38 = vld [vmem:[#allocation10 + $0xd4] sm:$0xf]  ;;  %v162_v42 = vld [vmem:[#allocation7] sm:$0x3]  ;;  %v1479_v46 = vor.u32 %v1768_v39, %v1476_v40 }
  0x50   :  { %599 = vmatpush.bf16.msrb.mxu1 %v1403_v35  ;;  %v1767_v48 = vld [vmem:[#allocation10 + $0x34] sm:$0xf0]  ;;  %v1766_v50 = vld [vmem:[#allocation10 + $0x34] sm:$0xf]  ;;  %v1468_v51 = vld [vmem:[#allocation10 + $0x38] sm:$0xf0] }
  0x51   :  { %612 = vmatpush.bf16.msrb.mxu2 %v1343_v25  ;;  %v1484_v25 = vld [vmem:[#allocation10 + $0x58] sm:$0xf0]  ;;  %v1471_v54 = vor.u32 %v1766_v50, %v1468_v51  ;;  %v1785_v8 = vld [vmem:[#allocation10 + $0xc4] sm:$0xf0]  ;;  %v1784_v9 = vld [vmem:[#allocation10 + $0xc4] sm:$0xf] }
  0x52   :  { %625 = vmatpush.bf16.msrb.mxu3 %v1407_v37  ;;  %v1487_v35 = vor.u32 %v1770_v24, %v1484_v25  ;;  %v1787_v37 = vld [vmem:[#allocation10 + $0xd4] sm:$0xf0]  ;;  %v1458_v13 = vld [vmem:[#allocation10 + $0x20] sm:$0xf]  ;;  %v1765_v14 = vld [vmem:[#allocation10 + $0x24] sm:$0xf0] }
  0x53   :  { %587 = vmatpush.bf16.msrb.mxu0 %v1331_v30  ;;  %v1556_v30 = vld [vmem:[#allocation10 + $0xe8] sm:$0xf0]  ;;  %v1459_v16 = vor.u32 %v1765_v14, %v1458_v13  ;;  %v1530_v18 = vld [vmem:[#allocation10 + $0xb0] sm:$0xf]  ;;  %v1763_v26 = vld [vmem:[#allocation10 + $0x14] sm:$0xf0] }
  0x54   :  { %600 = vmatpush.bf16.msrb.mxu1 %v1395_v47  ;;  %v1559_v32 = vor.u32 %v1788_v29, %v1556_v30  ;;  %v1466_v47 = vld [vmem:[#allocation10 + $0x30] sm:$0xf]  ;;  %v1460_v17 = vld [vmem:[#allocation10 + $0x28] sm:$0xf0]  ;;  %v1762_v27 = vld [vmem:[#allocation10 + $0x14] sm:$0xf] }
  0x55   :  { %613 = vmatpush.bf16.msrb.mxu2 %v1335_v31  ;;  %v1483_v31 = vor.u32 %v1771_v23, %v1482_v22  ;;  %v1467_v52 = vor.u32 %v1767_v48, %v1466_v47  ;;  %v1782_v22 = vld [vmem:[#allocation10 + $0xb4] sm:$0xf]  ;;  %v1532_v23 = vld [vmem:[#allocation10 + $0xb8] sm:$0xf0]  ;;  %v1450_v25 = vld [vmem:[#allocation10 + $0x10] sm:$0xf] }
  0x56   :  { %626 = vmatpush.bf16.msrb.mxu3 %v1399_v49  ;;  %v164_v49 = vperm.slane %v162_v42, 0  ;;  %v1535_v24 = vor.u32 %v1782_v22, %v1532_v23  ;;  %v1452_v29 = vld [vmem:[#allocation10 + $0x18] sm:$0xf0]  ;;  %v1780_v33 = vld [vmem:[#allocation10 + $0xa4] sm:$0xf]  ;;  %s1164_s3 = sshll.u32 %s2047_s9, 4  ;;  %s1165_s3 = int_to_ptr.vmem [resolvable:$true] %s1164_s3 }
  0x57   :  { %588 = vmatpush.bf16.msrb.mxu0 %v1323_v41  ;;  %v1548_v41 = vld [vmem:[#allocation10 + $0xd8] sm:$0xf0]  ;;  %v1455_v30 = vor.u32 %v1762_v27, %v1452_v29  ;;  %v1760_v39 = vld [vmem:[#allocation10 + $0x4] sm:$0xf]  ;;  %v1777_v50 = vld [vmem:[#allocation10 + $0x84] sm:$0xf0] }
  0x58   :  { %601 = vmatpush.bf16.msrb.mxu1 %v1387_v58  ;;  %v1551_v44 = vor.u32 %v1786_v38, %v1548_v41  ;;  %v165_v58 = vperm.slane %v162_v42, 1  ;;  %v1761_v38 = vld [vmem:[#allocation10 + $0x4] sm:$0xf0]  ;;  %v1444_v41 = vld [vmem:[#allocation10 + $0x8] sm:$0xf0]  ;;  %s1166_s29 = sshll.u32 %s2158_s10, 4  ;;  %s1167_s29 = int_to_ptr.hbm [resolvable:$true] %s1166_s29 }
  0x59   :  { %614 = vmatpush.bf16.msrb.mxu2 %v1327_v43  ;;  %v1547_v43 = vor.u32 %v1787_v37, %v1546_v36  ;;  %v1442_v37 = vld [vmem:[#allocation10] sm:$0xf]  ;;  %v1447_v42 = vor.u32 %v1760_v39, %v1444_v41  ;;  %v1516_v47 = vld [vmem:[#allocation10 + $0x98] sm:$0xf0]  ;;  %v1776_v51 = vld [vmem:[#allocation10 + $0x84] sm:$0xf] }
  0x5a   :  { %627 = vmatpush.bf16.msrb.mxu3 %v1391_v61  ;;  %v1443_v40 = vor.u32 %v1761_v38, %v1442_v37  ;;  %v1682_v13 = vld [vmem:[#allocation11 + $0xe0] sm:$0xf]  ;;  %v1821_v14 = vld [vmem:[#allocation11 + $0xe4] sm:$0xf0]  ;;  %v1800_v27 = vld [vmem:[#allocation11 + $0x44] sm:$0xf] }
  0x5b   :  { %589 = vmatpush.bf16.msrb.mxu0 %v1315_v53  ;;  %v1801_v22 = vld [vmem:[#allocation11 + $0x44] sm:$0xf0]  ;;  %v1676_v29 = vld [vmem:[#allocation11 + $0xd8] sm:$0xf0]  ;;  %v1799_v37 = vld [vmem:[#allocation11 + $0x34] sm:$0xf0] }
  0x5c   :  { %602 = vmatpush.bf16.msrb.mxu1 %v1379_v1  ;;  %v1798_v38 = vld [vmem:[#allocation11 + $0x34] sm:$0xf]  ;;  %v1596_v39 = vld [vmem:[#allocation11 + $0x38] sm:$0xf0] }
  0x5d   :  { %615 = vmatpush.bf16.msrb.mxu2 %v1319_v55 }
  0x5e   :  { %628 = vmatpush.bf16.msrb.mxu3 %v1383_v3 }
  0x5f   :  { %838 = vmatpush.bf16.msra.mxu0 %v1499_v7  ;;  %v1538_v7 = vld [vmem:[#allocation10 + $0xc0] sm:$0xf] }
  0x60   :  { %851 = vmatpush.bf16.msra.mxu1 %v1563_v20  ;;  %v1539_v10 = vor.u32 %v1785_v8, %v1538_v7 }
  0x61   :  { %864 = vmatpush.bf16.msra.mxu2 %v1503_v11  ;;  %v1540_v11 = vld [vmem:[#allocation10 + $0xc8] sm:$0xf0] }
  0x62   :  { %877 = vmatpush.bf16.msra.mxu3 %v1567_v21  ;;  %v1543_v12 = vor.u32 %v1784_v9, %v1540_v11  ;;  %v1610_v9 = vld [vmem:[#allocation11 + $0x50] sm:$0xf]  ;;  %v1802_v11 = vld [vmem:[#allocation11 + $0x54] sm:$0xf] }
  0x63   :  { %839 = vmatpush.bf16.msra.mxu0 %v1491_v15  ;;  %v1764_v15 = vld [vmem:[#allocation10 + $0x24] sm:$0xf] }
  0x64   :  { %852 = vmatpush.bf16.msra.mxu1 %v1555_v28  ;;  %v1463_v20 = vor.u32 %v1764_v15, %v1460_v17  ;;  %v1451_v28 = vor.u32 %v1763_v26, %v1450_v25  ;;  %v1683_v15 = vor.u32 %v1821_v14, %v1682_v13  ;;  %v1684_v17 = vld [vmem:[#allocation11 + $0xe8] sm:$0xf0]  ;;  %v1819_v25 = vld [vmem:[#allocation11 + $0xd4] sm:$0xf0]  ;;  %v1818_v26 = vld [vmem:[#allocation11 + $0xd4] sm:$0xf] }
  0x65   :  { %865 = vmatpush.bf16.msra.mxu2 %v1495_v19  ;;  %v1783_v19 = vld [vmem:[#allocation10 + $0xb4] sm:$0xf0]  ;;  %v1794_v14 = vld [vmem:[#allocation11 + $0x14] sm:$0xf] }
  0x66   :  { %878 = vmatpush.bf16.msra.mxu3 %v1559_v32  ;;  %v1531_v21 = vor.u32 %v1783_v19, %v1530_v18  ;;  %v1781_v32 = vld [vmem:[#allocation10 + $0xa4] sm:$0xf0]  ;;  %v416_v18 = vld [vmem:[%s2152_s4] sm:$0x3]  ;;  %v1795_v13 = vld [vmem:[#allocation11 + $0x14] sm:$0xf0] }
  0x67   :  { %840 = vmatpush.bf16.msra.mxu0 %v1483_v31  ;;  %v1522_v31 = vld [vmem:[#allocation10 + $0xa0] sm:$0xf] }
  0x68   :  { %853 = vmatpush.bf16.msra.mxu1 %v1547_v43  ;;  %v1523_v34 = vor.u32 %v1781_v32, %v1522_v31  ;;  %v1514_v43 = vld [vmem:[#allocation10 + $0x90] sm:$0xf]  ;;  %v1679_v31 = vor.u32 %v1818_v26, %v1676_v29  ;;  %v418_v32 = vperm.slane %v416_v18, 0  ;;  %v1792_v26 = vld [vmem:[#allocation11 + $0x4] sm:$0xf] }
  0x69   :  { %866 = vmatpush.bf16.msra.mxu2 %v1487_v35  ;;  %v1524_v35 = vld [vmem:[#allocation10 + $0xa8] sm:$0xf0] }
  0x6a   :  { %879 = vmatpush.bf16.msra.mxu3 %v1551_v44  ;;  %v1527_v36 = vor.u32 %v1780_v33, %v1524_v35  ;;  %v1779_v44 = vld [vmem:[#allocation10 + $0x94] sm:$0xf0] }
  0x6b   :  { %841 = vmatpush.bf16.msra.mxu0 %v1475_v45  ;;  %v1515_v45 = vor.u32 %v1779_v44, %v1514_v43  ;;  %v419_v43 = vperm.slane %v416_v18, 1  ;;  %v1650_v18 = vld [vmem:[#allocation11 + $0xa0] sm:$0xf] }
  0x6c   :  { %854 = vmatpush.bf16.msra.mxu1 %v1539_v10  ;;  %v1803_v10 = vld [vmem:[#allocation11 + $0x54] sm:$0xf0] }
  0x6d   :  { %867 = vmatpush.bf16.msra.mxu2 %v1479_v46  ;;  %v1778_v46 = vld [vmem:[#allocation10 + $0x94] sm:$0xf]  ;;  %v1611_v19 = vor.u32 %v1803_v10, %v1610_v9  ;;  %v1660_v10 = vld [vmem:[#allocation11 + $0xb8] sm:$0xf0] }
  0x6e   :  { %880 = vmatpush.bf16.msra.mxu3 %v1543_v12  ;;  %v1519_v48 = vor.u32 %v1778_v46, %v1516_v47  ;;  %v1612_v12 = vld [vmem:[#allocation11 + $0x58] sm:$0xf0]  ;;  %v1814_v9 = vld [vmem:[#allocation11 + $0xb4] sm:$0xf] }
  0x6f   :  { %842 = vmatpush.bf16.msra.mxu0 %v1467_v52  ;;  %v1615_v23 = vor.u32 %v1802_v11, %v1612_v12  ;;  %v1663_v11 = vor.u32 %v1814_v9, %v1660_v10  ;;  %v1578_v12 = vld [vmem:[#allocation11 + $0x10] sm:$0xf] }
  0x70   :  { %855 = vmatpush.bf16.msra.mxu1 %v1531_v21  ;;  %v1602_v21 = vld [vmem:[#allocation11 + $0x40] sm:$0xf] }
  0x71   :  { %868 = vmatpush.bf16.msra.mxu2 %v1471_v54 }
  0x72   :  { %881 = vmatpush.bf16.msra.mxu3 %v1535_v24  ;;  %v1674_v24 = vld [vmem:[#allocation11 + $0xd0] sm:$0xf] }
  0x73   :  { %843 = vmatpush.bf16.msra.mxu0 %v1459_v16  ;;  %v1820_v16 = vld [vmem:[#allocation11 + $0xe4] sm:$0xf] }
  0x74   :  { %856 = vmatpush.bf16.msra.mxu1 %v1523_v34  ;;  %v1603_v34 = vor.u32 %v1801_v22, %v1602_v21  ;;  %v1812_v21 = vld [vmem:[#allocation11 + $0xa4] sm:$0xf]  ;;  %v1652_v22 = vld [vmem:[#allocation11 + $0xa8] sm:$0xf0] }
  0x75   :  { %869 = vmatpush.bf16.msra.mxu2 %v1463_v20  ;;  %v1687_v20 = vor.u32 %v1820_v16, %v1684_v17  ;;  %v1580_v16 = vld [vmem:[#allocation11 + $0x18] sm:$0xf0] }
  0x76   :  { %882 = vmatpush.bf16.msra.mxu3 %v1527_v36  ;;  %v1594_v36 = vld [vmem:[#allocation11 + $0x30] sm:$0xf]  ;;  %v1583_v17 = vor.u32 %v1794_v14, %v1580_v16 }
  0x77   :  { %844 = vmatpush.bf16.msra.mxu0 %v1451_v28  ;;  %v1604_v28 = vld [vmem:[#allocation11 + $0x48] sm:$0xf0]  ;;  %v1595_v41 = vor.u32 %v1799_v37, %v1594_v36  ;;  %v1634_v36 = vld [vmem:[#allocation11 + $0x80] sm:$0xf]  ;;  %v1809_v37 = vld [vmem:[#allocation11 + $0x84] sm:$0xf0] }
  0x78   :  { %857 = vmatpush.bf16.msra.mxu1 %v1515_v45  ;;  %v1607_v35 = vor.u32 %v1800_v27, %v1604_v28  ;;  %v1572_v28 = vld [vmem:[#allocation11 + $0x8] sm:$0xf0] }
  0x79   :  { %870 = vmatpush.bf16.msra.mxu2 %v1455_v30  ;;  %v1675_v30 = vor.u32 %v1819_v25, %v1674_v24  ;;  %v1570_v24 = vld [vmem:[#allocation11] sm:$0xf]  ;;  %v1793_v25 = vld [vmem:[#allocation11 + $0x4] sm:$0xf0]  ;;  %v1575_v29 = vor.u32 %v1792_v26, %v1572_v28 }
  0x7a   :  { %883 = vmatpush.bf16.msra.mxu3 %v1519_v48  ;;  %v1571_v27 = vor.u32 %v1793_v25, %v1570_v24 }
  0x7b   :  { %845 = vmatpush.bf16.msra.mxu0 %v1443_v40 }
  0x7d   :  { %871 = vmatpush.bf16.msra.mxu2 %v1447_v42  ;;  %v1599_v42 = vor.u32 %v1798_v38, %v1596_v39  ;;  %v1808_v38 = vld [vmem:[#allocation11 + $0x84] sm:$0xf]  ;;  %v1635_v39 = vor.u32 %v1809_v37, %v1634_v36 }
  0xbb   :  { %v337_v53 = vpop.f32.mrf.mxu0 }
  0xbc   :  { %v338_v55 = vadd.f32 %v337_v53, %v164_v49  ;;  %v350_v56 = vpop.f32.mrf.mxu1  ;;  %v1506_v49 = vld [vmem:[#allocation10 + $0x80] sm:$0xf]  ;;  %v1508_v53 = vld [vmem:[#allocation10 + $0x88] sm:$0xf0] }
  0xbd   :  { %v1507_v52 = vor.u32 %v1777_v50, %v1506_v49  ;;  %v1511_v54 = vor.u32 %v1776_v51, %v1508_v53 }
  0xbe   :  { %v351_v57 = vadd.f32 %v350_v56, %v338_v55  ;;  %v1626_v55 = vld [vmem:[#allocation11 + $0x70] sm:$0xf]  ;;  %v1807_v56 = vld [vmem:[#allocation11 + $0x74] sm:$0xf0] }
  0xbf   :  { %858 = vmatpush.bf16.msra.mxu1 %v1507_v52  ;;  %884 = vmatpush.bf16.msra.mxu3 %v1511_v54 }
  0xc0   :  { %v380_v59 = vmax.f32 %v351_v57, 0.0  ;;  %v1806_v57 = vld [vmem:[#allocation11 + $0x74] sm:$0xf] }
  0xc2   :  { %v382_v60 = vpack.c.bf16 %v380_v59, %v380_v59  ;;  %v1628_v59 = vld [vmem:[#allocation11 + $0x78] sm:$0xf0] }
  0xc3   :  { %v363_v61 = vpop.f32.mrf.mxu2  ;;  %v339_v0 = vpop.f32.mrf.mxu0 }
  0xc4   :  { %v364_v62 = vadd.f32 %v363_v61, %v165_v58  ;;  %v376_v63 = vpop.f32.mrf.mxu3  ;;  %v352_v1 = vpop.f32.mrf.mxu1  ;;  %590 = vmatmul.bf16.vlgmr.msrb.gmra.mxu0 %v382_v60  ;;  %616 = vmatmul.bf16.vlgmr.msrb.gmra.mxu2 %v382_v60  ;;  %v1627_v58 = vor.u32 %v1807_v56, %v1626_v55  ;;  %v1618_v60 = vld [vmem:[#allocation11 + $0x60] sm:$0xf]  ;;  %v1805_v61 = vld [vmem:[#allocation11 + $0x64] sm:$0xf0]  ;;  %v1620_v0 = vld [vmem:[#allocation11 + $0x68] sm:$0xf0] }
  0xc5   :  { %v1690_v1 = vld [vmem:[#allocation11 + $0xf0] sm:$0xf] }
  0xc6   :  { %v377_v2 = vadd.f32 %v376_v63, %v364_v62  ;;  %v1631_v62 = vor.u32 %v1806_v57, %v1628_v59  ;;  %v1804_v63 = vld [vmem:[#allocation11 + $0x64] sm:$0xf]  ;;  %1092 = vmatpush.bf16.msrb.mxu0 %v1627_v58  ;;  %v1666_v58 = vld [vmem:[#allocation11 + $0xc0] sm:$0xf]  ;;  %v1817_v59 = vld [vmem:[#allocation11 + $0xc4] sm:$0xf0] }
  0xc8   :  { %v381_v3 = vmax.f32 %v377_v2, 0.0  ;;  %v1619_v2 = vor.u32 %v1805_v61, %v1618_v60  ;;  %1118 = vmatpush.bf16.msrb.mxu2 %v1631_v62  ;;  %v1816_v60 = vld [vmem:[#allocation11 + $0xc4] sm:$0xf]  ;;  %v1667_v61 = vor.u32 %v1817_v59, %v1666_v58  ;;  %v1668_v62 = vld [vmem:[#allocation11 + $0xc8] sm:$0xf0] }
  0xca   :  { %v383_v4 = vpack.c.bf16 %v381_v3, %v381_v3  ;;  %v1823_v3 = vld [vmem:[#allocation11 + $0xf4] sm:$0xf0]  ;;  %1093 = vmatpush.bf16.msrb.mxu0 %v1619_v2  ;;  %v1796_v2 = vld [vmem:[#allocation11 + $0x24] sm:$0xf] }
  0xcb   :  { %v365_v5 = vpop.f32.mrf.mxu2  ;;  %v1691_v7 = vor.u32 %v1823_v3, %v1690_v1  ;;  %v1797_v1 = vld [vmem:[#allocation11 + $0x24] sm:$0xf0] }
  0xcc   :  { %v378_v6 = vpop.f32.mrf.mxu3  ;;  %603 = vmatmul.bf16.vlgmr.msrb.gmra.mxu1 %v383_v4  ;;  %629 = vmatmul.bf16.vlgmr.msrb.gmra.mxu3 %v383_v4  ;;  %v1822_v4 = vld [vmem:[#allocation11 + $0xf4] sm:$0xf]  ;;  %v1692_v5 = vld [vmem:[#allocation11 + $0xf8] sm:$0xf0] }
  0xcd   :  { %v1623_v6 = vor.u32 %v1804_v63, %v1620_v0  ;;  %v1695_v8 = vor.u32 %v1822_v4, %v1692_v5  ;;  %1105 = vmatpush.bf16.msrb.mxu1 %v1691_v7  ;;  %v1671_v63 = vor.u32 %v1816_v60, %v1668_v62  ;;  %v1586_v0 = vld [vmem:[#allocation11 + $0x20] sm:$0xf]  ;;  %v1588_v4 = vld [vmem:[#allocation11 + $0x28] sm:$0xf0]  ;;  %v1658_v5 = vld [vmem:[#allocation11 + $0xb0] sm:$0xf] }
  0xce   :  { %1094 = vmatpush.bf16.msrb.mxu0 %v1611_v19  ;;  %v1587_v3 = vor.u32 %v1797_v1, %v1586_v0  ;;  %v1591_v7 = vor.u32 %v1796_v2, %v1588_v4  ;;  %v1813_v19 = vld [vmem:[#allocation11 + $0xa4] sm:$0xf0] }
  0xcf   :  { %1131 = vmatpush.bf16.msrb.mxu3 %v1695_v8  ;;  %1119 = vmatpush.bf16.msrb.mxu2 %v1623_v6  ;;  %v1815_v6 = vld [vmem:[#allocation11 + $0xb4] sm:$0xf0] }
  0xd0   :  { %v1659_v8 = vor.u32 %v1815_v6, %v1658_v5 }
  0xd1   :  { %1106 = vmatpush.bf16.msrb.mxu1 %v1683_v15  ;;  %v1579_v15 = vor.u32 %v1795_v13, %v1578_v12 }
  0xd2   :  { %1095 = vmatpush.bf16.msrb.mxu0 %v1603_v34  ;;  %v1644_v34 = vld [vmem:[#allocation11 + $0x98] sm:$0xf0] }
  0xd3   :  { %1132 = vmatpush.bf16.msrb.mxu3 %v1687_v20  ;;  %1120 = vmatpush.bf16.msrb.mxu2 %v1615_v23  ;;  %v1651_v20 = vor.u32 %v1813_v19, %v1650_v18  ;;  %v1655_v23 = vor.u32 %v1812_v21, %v1652_v22 }
  0xd5   :  { %1107 = vmatpush.bf16.msrb.mxu1 %v1675_v30  ;;  %v1642_v30 = vld [vmem:[#allocation11 + $0x90] sm:$0xf] }
  0xd6   :  { %1096 = vmatpush.bf16.msrb.mxu0 %v1595_v41 }
  0xd7   :  { %1133 = vmatpush.bf16.msrb.mxu3 %v1679_v31  ;;  %1121 = vmatpush.bf16.msrb.mxu2 %v1607_v35  ;;  %v1811_v31 = vld [vmem:[#allocation11 + $0x94] sm:$0xf0] }
  0xd9   :  { %1108 = vmatpush.bf16.msrb.mxu1 %v1667_v61  ;;  %v926_v61 = vld [vmem:[%s2156_s8] sm:$0x3] }
  0xda   :  { %1097 = vmatpush.bf16.msrb.mxu0 %v1587_v3  ;;  %v929_v4 = vperm.slane %v926_v61, 1 }
  0xdb   :  { %1122 = vmatpush.bf16.msrb.mxu2 %v1599_v42  ;;  %1134 = vmatpush.bf16.msrb.mxu3 %v1671_v63  ;;  %v672_v42 = vld [vmem:[%s2154_s6] sm:$0x3]  ;;  %s2046_s6 = smov [#allocation13]   ;;  %v928_v63 = vperm.slane %v926_v61, 0 }
  0xdc   :  { %s1153_s22 = sshll.u32 %s2046_s6, 4  ;;  %s1154_s22 = int_to_ptr.vmem [resolvable:$true] %s1153_s22 }
  0xdd   :  { %1109 = vmatpush.bf16.msrb.mxu1 %v1659_v8 }
  0xde   :  { %1098 = vmatpush.bf16.msrb.mxu0 %v1579_v15 }
  0xdf   :  { %1123 = vmatpush.bf16.msrb.mxu2 %v1591_v7  ;;  %1135 = vmatpush.bf16.msrb.mxu3 %v1663_v11 }
  0xe1   :  { %1110 = vmatpush.bf16.msrb.mxu1 %v1651_v20 }
  0xe2   :  { %1099 = vmatpush.bf16.msrb.mxu0 %v1571_v27 }
  0xe3   :  { %1124 = vmatpush.bf16.msrb.mxu2 %v1583_v17  ;;  %1136 = vmatpush.bf16.msrb.mxu3 %v1655_v23 }
  0xe7   :  { %1125 = vmatpush.bf16.msrb.mxu2 %v1575_v29 }
 0x141   :  { %v591_v33 = vpop.f32.mrf.mxu0 }
 0x142   :  { %v592_v40 = vadd.f32 %v591_v33, %v418_v32  ;;  %v1810_v32 = vld [vmem:[#allocation11 + $0x94] sm:$0xf]  ;;  %v1643_v33 = vor.u32 %v1811_v31, %v1642_v30 }
 0x143   :  { %v1647_v35 = vor.u32 %v1810_v32, %v1644_v34 }
 0x144   :  { %1111 = vmatpush.bf16.msrb.mxu1 %v1643_v33 }
 0x145   :  { %1137 = vmatpush.bf16.msrb.mxu3 %v1647_v35 }
 0x147   :  { %v617_v44 = vpop.f32.mrf.mxu2 }
 0x148   :  { %v618_v49 = vadd.f32 %v617_v44, %v419_v43  ;;  %1112 = vmatpush.bf16.msrb.mxu1 %v1635_v39  ;;  %v674_v44 = vperm.slane %v672_v42, 0 }
 0x149   :  { %v604_v45 = vpop.f32.mrf.mxu1  ;;  %v593_v47 = vpop.f32.mrf.mxu0 }
 0x14a   :  { %v605_v46 = vadd.f32 %v604_v45, %v592_v40  ;;  %v1636_v40 = vld [vmem:[#allocation11 + $0x88] sm:$0xf0] }
 0x14b   :  { %v1639_v41 = vor.u32 %v1808_v38, %v1636_v40 }
 0x14c   :  { %v634_v48 = vmax.f32 %v605_v46, 0.0 }
 0x14d   :  { %1138 = vmatpush.bf16.msrb.mxu3 %v1639_v41 }
 0x14e   :  { %636 = vst [vmem:[#allocation13] sm:$0xff] %v634_v48  ;;  %v638_v50 = vpack.c.bf16 %v634_v48, %v634_v48 }
 0x14f   :  { %v630_v51 = vpop.f32.mrf.mxu3  ;;  %v619_v53 = vpop.f32.mrf.mxu2 }
 0x150   :  { %v631_v52 = vadd.f32 %v630_v51, %v618_v49  ;;  %846 = vmatmul.bf16.vlgmr.msra.gmra.mxu0 %v638_v50  ;;  %872 = vmatmul.bf16.vlgmr.msra.gmra.mxu2 %v638_v50  ;;  %v675_v49 = vperm.slane %v672_v42, 1 }
 0x151   :  { %v606_v54 = vpop.f32.mrf.mxu1 }
 0x152   :  { %v635_v55 = vmax.f32 %v631_v52, 0.0 }
 0x154   :  { %637 = vst [vmem:[#allocation13 + $0x8] sm:$0xff] %v635_v55  ;;  %v639_v56 = vpack.c.bf16 %v635_v55, %v635_v55 }
 0x155   :  { %1158 = dma.vmem_to_hbm [thread:$0]  %s1154_s22, 256, %s1156_s25, [#allocation4]  }
 0x156   :  { %859 = vmatmul.bf16.vlgmr.msra.gmra.mxu1 %v639_v56  ;;  %885 = vmatmul.bf16.vlgmr.msra.gmra.mxu3 %v639_v56 }
 0x157   :  { %v632_v57 = vpop.f32.mrf.mxu3 }
 0x1cd   :  { %v847_v43 = vpop.f32.mrf.mxu0 }
 0x1ce   :  { %v848_v45 = vadd.f32 %v847_v43, %v674_v44 }
 0x1d3   :  { %v860_v46 = vpop.f32.mrf.mxu1  ;;  %v873_v47 = vpop.f32.mrf.mxu2 }
 0x1d4   :  { %v861_v48 = vadd.f32 %v860_v46, %v848_v45  ;;  %v874_v53 = vadd.f32 %v873_v47, %v675_v49 }
 0x1d5   :  { %v849_v50 = vpop.f32.mrf.mxu0 }
 0x1d6   :  { %v890_v51 = vmax.f32 %v861_v48, 0.0 }
 0x1d8   :  { %v892_v52 = vpack.c.bf16 %v890_v51, %v890_v51 }
 0x1d9   :  { %v886_v54 = vpop.f32.mrf.mxu3 }
 0x1da   :  { %v887_v55 = vadd.f32 %v886_v54, %v874_v53  ;;  %1100 = vmatmul.bf16.vlgmr.msrb.gmra.mxu0 %v892_v52  ;;  %1126 = vmatmul.bf16.vlgmr.msrb.gmra.mxu2 %v892_v52 }
 0x1db   :  { %v862_v56 = vpop.f32.mrf.mxu1  ;;  %v875_v57 = vpop.f32.mrf.mxu2 }
 0x1dc   :  { %v891_v58 = vmax.f32 %v887_v55, 0.0 }
 0x1de   :  { %v893_v59 = vpack.c.bf16 %v891_v58, %v891_v58 }
 0x1e0   :  { %1113 = vmatmul.bf16.vlgmr.msrb.gmra.mxu1 %v893_v59  ;;  %1139 = vmatmul.bf16.vlgmr.msrb.gmra.mxu3 %v893_v59 }
 0x1e1   :  { %v888_v60 = vpop.f32.mrf.mxu3 }
 0x257   :  { %v1101_v62 = vpop.f32.mrf.mxu0 }
 0x258   :  { %v1102_v0 = vadd.f32 %v1101_v62, %v928_v63 }
 0x25d   :  { %v1114_v1 = vpop.f32.mrf.mxu1  ;;  %v1127_v2 = vpop.f32.mrf.mxu2 }
 0x25e   :  { %v1115_v3 = vadd.f32 %v1114_v1, %v1102_v0  ;;  %v1128_v7 = vadd.f32 %v1127_v2, %v929_v4 }
 0x25f   :  { %v1103_v5 = vpop.f32.mrf.mxu0 }
 0x260   :  { %v1144_v6 = vmax.f32 %v1115_v3, 0.0 }
 0x262   :  { %1146 = vst [vmem:[#allocation14] sm:$0xff] %v1144_v6 }
 0x263   :  { %v1140_v8 = vpop.f32.mrf.mxu3 }
 0x264   :  { %v1141_v9 = vadd.f32 %v1140_v8, %v1128_v7 }
 0x265   :  { %v1116_v10 = vpop.f32.mrf.mxu1  ;;  %v1129_v11 = vpop.f32.mrf.mxu2 }
 0x266   :  { %v1145_v12 = vmax.f32 %v1141_v9, 0.0 }
 0x268   :  { %1147 = vst [vmem:[#allocation14 + $0x8] sm:$0xff] %v1145_v12 }
 0x269   :  { %1169 = dma.vmem_to_hbm [thread:$0]  %s1165_s3, 256, %s1167_s29, [#allocation15]  }
 0x26b   :  { %v1142_v13 = vpop.f32.mrf.mxu3 }
 0x26c   :  { %2034 = dma.done.wait [#allocation4], 256  }
 0x26d   :  { %2035 = vsyncadd [#allocation4], 4294967040 }
 0x26e   :  { %2036 = dma.done.wait [#allocation15], 256  }
 0x26f   :  { %2037 = vsyncadd [#allocation15], 4294967040 }
 0x270   :  { %1178 = vsyncpa [#allocation3], 1 }
 0x271   :  { %1179 = vsyncpa [#allocation6], 1 }
 0x272   :  { %1180 = vsyncpa [#allocation9], 1 }
 0x273   :  { %1181 = vsyncpa [#allocation12], 1 }
 0x274   :  { %1182 = vsyncpa [#allocation4], 1 }
 0x275   :  { %1183 = vsyncpa [#allocation15], 1 }

// kernel: _fused_mlp2.1
= control target key start
LH: loop header
LB: loop body
LE: loop exit
PB: predicated region body
PF: predicated region fallthrough
CT: control target
= control target key end

     0   :  { %16 = vsyncpa [#allocation3], 0  ;;  %s2148_s0 = inlined_call_operand.hbm [shape: f32[8,256], index: 0, kind: input, shape index: {}]   ;;  %s2149_s1 = inlined_call_operand.hbm [shape: bf16[256,256], index: 1, kind: input, shape index: {}]   ;;  %s2150_s2 = inlined_call_operand.hbm [shape: f32[1,256], index: 2, kind: input, shape index: {}]   ;;  %s2151_s3 = inlined_call_operand.hbm [shape: bf16[256,256], index: 3, kind: input, shape index: {}]   ;;  %s2152_s4 = inlined_call_operand.vmem [shape: f32[1,256], index: 4, kind: input, shape index: {}]   ;;  %s2153_s5 = inlined_call_operand.hbm [shape: bf16[256,256], index: 5, kind: input, shape index: {}]   ;;  %s2154_s6 = inlined_call_operand.vmem [shape: f32[1,256], index: 6, kind: input, shape index: {}]   ;;  %s2155_s7 = inlined_call_operand.hbm [shape: bf16[256,256], index: 7, kind: input, shape index: {}]   ;;  %s2156_s8 = inlined_call_operand.vmem [shape: f32[1,256], index: 8, kind: input, shape index: {}]   ;;  %s2157_s9 = inlined_call_operand.hbm [shape: f32[8,256], index: 9, kind: output, shape index: {0}]   ;;  %s2158_s10 = inlined_call_operand.hbm [shape: f32[8,256], index: 10, kind: output, shape index: {1}]  }
   0x1   :  { %17 = vsyncpa [#allocation6], 0 }
   0x2   :  { %18 = vsyncpa [#allocation9], 0 }
   0x3   :  { %19 = vsyncpa [#allocation12], 0 }
   0x4   :  { %20 = vsyncpa [#allocation4], 0  ;;  %s37_s15 = sshll.u32 %s2149_s1, 4  ;;  %s38_s15 = int_to_ptr.hbm [resolvable:$true] %s37_s15 }
   0x5   :  { %21 = vsyncpa [#allocation15], 0  ;;  %s2038_s16 = smov [#allocation5]   ;;  %s61_s20 = sshll.u32 %s2151_s3, 4  ;;  %s62_s20 = int_to_ptr.hbm [resolvable:$true] %s61_s20 }
   0x6   :  { %s39_s17 = sshll.u32 %s2038_s16, 4  ;;  %s2039_s21 = smov 128   ;;  %s40_s17 = int_to_ptr.vmem [resolvable:$true] %s39_s17 }
   0x7   :  { %s2040_s22 = smov 8   ;;  %s2041_s23 = smov [#allocation8]  }
   0x8   :  { %45 = dma.hbm_to_vmem [thread:$0]  %s38_s15, 4096, %s40_s17, [#allocation6], %s2039_s21, %s2039_s21, %s2040_s22  }
   0x9   :  { %s63_s24 = sshll.u32 %s2041_s23, 4  ;;  %s27_s26 = sshll.u32 %s2148_s0, 4  ;;  %s64_s24 = int_to_ptr.vmem [resolvable:$true] %s63_s24  ;;  %s28_s26 = int_to_ptr.hbm [resolvable:$true] %s27_s26 }
   0xa   :  { %69 = dma.hbm_to_vmem [thread:$0]  %s62_s20, 4096, %s64_s24, [#allocation9], %s2039_s21, %s2039_s21, %s2040_s22  }
   0xb   :  { %s51_s28 = sshll.u32 %s2150_s2, 4  ;;  %s2042_s29 = smov [#allocation2]   ;;  %s52_s28 = int_to_ptr.hbm [resolvable:$true] %s51_s28 }
   0xc   :  { %s29_s30 = sshll.u32 %s2042_s29, 4  ;;  %s2043_s11 = smov [#allocation7]   ;;  %s30_s30 = int_to_ptr.vmem [resolvable:$true] %s29_s30 }
   0xd   :  { %32 = dma.hbm_to_vmem [thread:$0]  %s28_s26, 256, %s30_s30, [#allocation3]  }
   0xe   :  { %s53_s12 = sshll.u32 %s2043_s11, 4  ;;  %s76_s0 = sshll.u32 %s2153_s5, 4  ;;  %s54_s12 = int_to_ptr.vmem [resolvable:$true] %s53_s12  ;;  %s77_s0 = int_to_ptr.hbm [resolvable:$true] %s76_s0 }
   0xf   :  { %56 = dma.hbm_to_vmem [thread:$0]  %s52_s28, 32, %s54_s12, [#allocation6]  }
  0x10   :  { %s91_s17 = sshll.u32 %s2155_s7, 4  ;;  %s2044_s18 = smov [#allocation10]   ;;  %s92_s17 = int_to_ptr.hbm [resolvable:$true] %s91_s17 }
  0x11   :  { %s78_s2 = sshll.u32 %s2044_s18, 4  ;;  %s2045_s19 = smov [#allocation11]   ;;  %s79_s2 = int_to_ptr.vmem [resolvable:$true] %s78_s2 }
  0x12   :  { %84 = dma.hbm_to_vmem [thread:$0]  %s77_s0, 4096, %s79_s2, [#allocation9], %s2039_s21, %s2039_s21, %s2040_s22  }
  0x13   :  { %s93_s20 = sshll.u32 %s2045_s19, 4  ;;  %s94_s20 = int_to_ptr.vmem [resolvable:$true] %s93_s20 }
  0x14   :  { %99 = dma.hbm_to_vmem [thread:$0]  %s92_s17, 4096, %s94_s20, [#allocation12], %s2039_s21, %s2039_s21, %s2040_s22  }
  0x15   :  { %2026 = dma.done.wait [#allocation3], 256  }
  0x16   :  { %2027 = vsyncadd [#allocation3], 4294967040 }
  0x17   :  { %2028 = dma.done.wait [#allocation6], 4128  }
  0x18   :  { %2029 = vsyncadd [#allocation6], 4294963168 }
  0x19   :  { %2030 = dma.done.wait [#allocation9], 8192  }
  0x1a   :  { %2031 = vsyncadd [#allocation9], 4294959104 }
  0x1b   :  { %2032 = dma.done.wait [#allocation12], 4096  }
  0x1c   :  { %2033 = vsyncadd [#allocation12], 4294963200  ;;  %v1242_v0 = vld [vmem:[#allocation5 + $0x70] sm:$0xf]  ;;  %v1711_v1 = vld [vmem:[#allocation5 + $0x74] sm:$0xf0] }
  0x1d   :  { %v1306_v2 = vld [vmem:[#allocation5 + $0xf0] sm:$0xf]  ;;  %v1243_v3 = vor.u32 %v1711_v1, %v1242_v0  ;;  %v1727_v4 = vld [vmem:[#allocation5 + $0xf4] sm:$0xf0]  ;;  %v1710_v5 = vld [vmem:[#allocation5 + $0x74] sm:$0xf] }
  0x1e   :  { %v1244_v6 = vld [vmem:[#allocation5 + $0x78] sm:$0xf0]  ;;  %v1307_v7 = vor.u32 %v1727_v4, %v1306_v2  ;;  %v1726_v9 = vld [vmem:[#allocation5 + $0xf4] sm:$0xf]  ;;  %v1234_v11 = vld [vmem:[#allocation5 + $0x60] sm:$0xf] }
  0x1f   :  { %v1247_v8 = vor.u32 %v1710_v5, %v1244_v6  ;;  %v1308_v10 = vld [vmem:[#allocation5 + $0xf8] sm:$0xf0]  ;;  %328 = vmatpush.bf16.msra.mxu0 %v1243_v3  ;;  %v1709_v13 = vld [vmem:[#allocation5 + $0x64] sm:$0xf0]  ;;  %v1298_v14 = vld [vmem:[#allocation5 + $0xe0] sm:$0xf] }
  0x20   :  { %v1311_v12 = vor.u32 %v1726_v9, %v1308_v10  ;;  %v1725_v15 = vld [vmem:[#allocation5 + $0xe4] sm:$0xf0]  ;;  %341 = vmatpush.bf16.msra.mxu1 %v1307_v7  ;;  %v1235_v16 = vor.u32 %v1709_v13, %v1234_v11  ;;  %v1708_v18 = vld [vmem:[#allocation5 + $0x64] sm:$0xf]  ;;  %v1236_v19 = vld [vmem:[#allocation5 + $0x68] sm:$0xf0] }
  0x21   :  { %354 = vmatpush.bf16.msra.mxu2 %v1247_v8  ;;  %v1299_v17 = vor.u32 %v1725_v15, %v1298_v14  ;;  %v1724_v20 = vld [vmem:[#allocation5 + $0xe4] sm:$0xf]  ;;  %v1239_v21 = vor.u32 %v1708_v18, %v1236_v19  ;;  %v1300_v22 = vld [vmem:[#allocation5 + $0xe8] sm:$0xf0]  ;;  %v1226_v23 = vld [vmem:[#allocation5 + $0x50] sm:$0xf] }
  0x22   :  { %367 = vmatpush.bf16.msra.mxu3 %v1311_v12  ;;  %v1707_v24 = vld [vmem:[#allocation5 + $0x54] sm:$0xf0]  ;;  %v1303_v25 = vor.u32 %v1724_v20, %v1300_v22  ;;  %v1290_v26 = vld [vmem:[#allocation5 + $0xd0] sm:$0xf]  ;;  %v1706_v28 = vld [vmem:[#allocation5 + $0x54] sm:$0xf] }
  0x23   :  { %v1723_v27 = vld [vmem:[#allocation5 + $0xd4] sm:$0xf0]  ;;  %329 = vmatpush.bf16.msra.mxu0 %v1235_v16  ;;  %v1227_v29 = vor.u32 %v1707_v24, %v1226_v23  ;;  %v1228_v30 = vld [vmem:[#allocation5 + $0x58] sm:$0xf0]  ;;  %v1722_v31 = vld [vmem:[#allocation5 + $0xd4] sm:$0xf] }
  0x24   :  { %v1292_v32 = vld [vmem:[#allocation5 + $0xd8] sm:$0xf0]  ;;  %342 = vmatpush.bf16.msra.mxu1 %v1299_v17  ;;  %v1291_v33 = vor.u32 %v1723_v27, %v1290_v26  ;;  %v1231_v34 = vor.u32 %v1706_v28, %v1228_v30  ;;  %v1218_v35 = vld [vmem:[#allocation5 + $0x40] sm:$0xf]  ;;  %v1705_v36 = vld [vmem:[#allocation5 + $0x44] sm:$0xf0] }
  0x25   :  { %355 = vmatpush.bf16.msra.mxu2 %v1239_v21  ;;  %v1282_v37 = vld [vmem:[#allocation5 + $0xc0] sm:$0xf]  ;;  %v1295_v38 = vor.u32 %v1722_v31, %v1292_v32  ;;  %v1721_v39 = vld [vmem:[#allocation5 + $0xc4] sm:$0xf0]  ;;  %v1704_v40 = vld [vmem:[#allocation5 + $0x44] sm:$0xf]  ;;  %v1219_v44 = vor.u32 %v1705_v36, %v1218_v35 }
  0x26   :  { %368 = vmatpush.bf16.msra.mxu3 %v1303_v25  ;;  %v1220_v41 = vld [vmem:[#allocation5 + $0x48] sm:$0xf0]  ;;  %v1720_v42 = vld [vmem:[#allocation5 + $0xc4] sm:$0xf]  ;;  %v1283_v45 = vor.u32 %v1721_v39, %v1282_v37  ;;  %v1210_v47 = vld [vmem:[#allocation5 + $0x30] sm:$0xf] }
  0x27   :  { %v1284_v43 = vld [vmem:[#allocation5 + $0xc8] sm:$0xf0]  ;;  %330 = vmatpush.bf16.msra.mxu0 %v1227_v29  ;;  %v1223_v46 = vor.u32 %v1704_v40, %v1220_v41  ;;  %v1703_v48 = vld [vmem:[#allocation5 + $0x34] sm:$0xf0]  ;;  %v1274_v49 = vld [vmem:[#allocation5 + $0xb0] sm:$0xf] }
  0x28   :  { %343 = vmatpush.bf16.msra.mxu1 %v1291_v33  ;;  %v1287_v50 = vor.u32 %v1720_v42, %v1284_v43  ;;  %v1719_v51 = vld [vmem:[#allocation5 + $0xb4] sm:$0xf0]  ;;  %v1702_v52 = vld [vmem:[#allocation5 + $0x34] sm:$0xf]  ;;  %v1212_v53 = vld [vmem:[#allocation5 + $0x38] sm:$0xf0]  ;;  %v1211_v56 = vor.u32 %v1703_v48, %v1210_v47 }
  0x29   :  { %356 = vmatpush.bf16.msra.mxu2 %v1231_v34  ;;  %v1718_v54 = vld [vmem:[#allocation5 + $0xb4] sm:$0xf]  ;;  %v1276_v55 = vld [vmem:[#allocation5 + $0xb8] sm:$0xf0]  ;;  %v1275_v57 = vor.u32 %v1719_v51, %v1274_v49  ;;  %v1215_v58 = vor.u32 %v1702_v52, %v1212_v53  ;;  %v1202_v59 = vld [vmem:[#allocation5 + $0x20] sm:$0xf] }
  0x2a   :  { %369 = vmatpush.bf16.msra.mxu3 %v1295_v38  ;;  %v1701_v60 = vld [vmem:[#allocation5 + $0x24] sm:$0xf0]  ;;  %v1266_v61 = vld [vmem:[#allocation5 + $0xa0] sm:$0xf]  ;;  %v1279_v62 = vor.u32 %v1718_v54, %v1276_v55  ;;  %v1700_v0 = vld [vmem:[#allocation5 + $0x24] sm:$0xf] }
  0x2b   :  { %331 = vmatpush.bf16.msra.mxu0 %v1219_v44  ;;  %v1717_v63 = vld [vmem:[#allocation5 + $0xa4] sm:$0xf0]  ;;  %v1204_v1 = vld [vmem:[#allocation5 + $0x28] sm:$0xf0]  ;;  %v1716_v2 = vld [vmem:[#allocation5 + $0xa4] sm:$0xf]  ;;  %v1203_v4 = vor.u32 %v1701_v60, %v1202_v59 }
  0x2c   :  { %344 = vmatpush.bf16.msra.mxu1 %v1283_v45  ;;  %v1268_v3 = vld [vmem:[#allocation5 + $0xa8] sm:$0xf0]  ;;  %v1267_v5 = vor.u32 %v1717_v63, %v1266_v61  ;;  %v1207_v6 = vor.u32 %v1700_v0, %v1204_v1  ;;  %v1194_v7 = vld [vmem:[#allocation5 + $0x10] sm:$0xf]  ;;  %v1699_v8 = vld [vmem:[#allocation5 + $0x14] sm:$0xf0] }
  0x2d   :  { %357 = vmatpush.bf16.msra.mxu2 %v1223_v46  ;;  %v1258_v9 = vld [vmem:[#allocation5 + $0x90] sm:$0xf]  ;;  %v1271_v10 = vor.u32 %v1716_v2, %v1268_v3  ;;  %v1715_v11 = vld [vmem:[#allocation5 + $0x94] sm:$0xf0]  ;;  %v1698_v12 = vld [vmem:[#allocation5 + $0x14] sm:$0xf]  ;;  %v1195_v16 = vor.u32 %v1699_v8, %v1194_v7 }
  0x2e   :  { %370 = vmatpush.bf16.msra.mxu3 %v1287_v50  ;;  %v1196_v13 = vld [vmem:[#allocation5 + $0x18] sm:$0xf0]  ;;  %v1714_v14 = vld [vmem:[#allocation5 + $0x94] sm:$0xf]  ;;  %v1186_v17 = vld [vmem:[#allocation5] sm:$0xf]  ;;  %v1259_v18 = vor.u32 %v1715_v11, %v1258_v9 }
  0x2f   :  { %332 = vmatpush.bf16.msra.mxu0 %v1211_v56  ;;  %v1260_v15 = vld [vmem:[#allocation5 + $0x98] sm:$0xf0]  ;;  %v1199_v19 = vor.u32 %v1698_v12, %v1196_v13  ;;  %v1697_v20 = vld [vmem:[#allocation5 + $0x4] sm:$0xf0]  ;;  %v1250_v21 = vld [vmem:[#allocation5 + $0x80] sm:$0xf] }
  0x30   :  { %345 = vmatpush.bf16.msra.mxu1 %v1275_v57  ;;  %v1713_v22 = vld [vmem:[#allocation5 + $0x84] sm:$0xf0]  ;;  %v1263_v23 = vor.u32 %v1714_v14, %v1260_v15  ;;  %v1696_v24 = vld [vmem:[#allocation5 + $0x4] sm:$0xf]  ;;  %v1188_v25 = vld [vmem:[#allocation5 + $0x8] sm:$0xf0]  ;;  %v1187_v30 = vor.u32 %v1697_v20, %v1186_v17 }
  0x31   :  { %358 = vmatpush.bf16.msra.mxu2 %v1215_v58  ;;  %v1712_v26 = vld [vmem:[#allocation5 + $0x84] sm:$0xf]  ;;  %v1252_v27 = vld [vmem:[#allocation5 + $0x88] sm:$0xf0]  ;;  %v1370_v28 = vld [vmem:[#allocation8 + $0x70] sm:$0xf]  ;;  %v1251_v34 = vor.u32 %v1713_v22, %v1250_v21  ;;  %v1191_v35 = vor.u32 %v1696_v24, %v1188_v25 }
  0x32   :  { %371 = vmatpush.bf16.msra.mxu3 %v1279_v62  ;;  %v1743_v29 = vld [vmem:[#allocation8 + $0x74] sm:$0xf0]  ;;  %v126_v31 = vld [vmem:[#allocation2] sm:$0xff]  ;;  %v1372_v33 = vld [vmem:[#allocation8 + $0x78] sm:$0xf0]  ;;  %v1255_v37 = vor.u32 %v1712_v26, %v1252_v27  ;;  %s1155_s25 = sshll.u32 %s2157_s9, 4  ;;  %s1156_s25 = int_to_ptr.hbm [resolvable:$true] %s1155_s25 }
  0x33   :  { %333 = vmatpush.bf16.msra.mxu0 %v1203_v4  ;;  %v1742_v32 = vld [vmem:[#allocation8 + $0x74] sm:$0xf]  ;;  %v1371_v38 = vor.u32 %v1743_v29, %v1370_v28  ;;  %v1362_v39 = vld [vmem:[#allocation8 + $0x60] sm:$0xf]  ;;  %v1434_v40 = vld [vmem:[#allocation8 + $0xf0] sm:$0xf]  ;;  %v128_v42 = vpack.c.bf16 %v126_v31, %v126_v31 }
  0x34   :  { %346 = vmatpush.bf16.msra.mxu1 %v1267_v5  ;;  %v127_v36 = vld [vmem:[#allocation2 + $0x8] sm:$0xff]  ;;  %v1375_v43 = vor.u32 %v1742_v32, %v1372_v33  ;;  %v1741_v44 = vld [vmem:[#allocation8 + $0x64] sm:$0xf0]  ;;  %v1740_v48 = vld [vmem:[#allocation8 + $0x64] sm:$0xf]  ;;  %s2047_s9 = smov [#allocation14]  }
  0x35   :  { %359 = vmatpush.bf16.msra.mxu2 %v1207_v6  ;;  %v1759_v41 = vld [vmem:[#allocation8 + $0xf4] sm:$0xf0]  ;;  %v1758_v45 = vld [vmem:[#allocation8 + $0xf4] sm:$0xf]  ;;  %v1436_v46 = vld [vmem:[#allocation8 + $0xf8] sm:$0xf0]  ;;  %v129_v47 = vpack.c.bf16 %v127_v36, %v127_v36  ;;  %v1363_v51 = vor.u32 %v1741_v44, %v1362_v39 }
  0x36   :  { %372 = vmatpush.bf16.msra.mxu3 %v1271_v10  ;;  %v1364_v49 = vld [vmem:[#allocation8 + $0x68] sm:$0xf0]  ;;  %v1435_v50 = vor.u32 %v1759_v41, %v1434_v40  ;;  %v1439_v52 = vor.u32 %v1758_v45, %v1436_v46  ;;  %v1354_v53 = vld [vmem:[#allocation8 + $0x50] sm:$0xf]  ;;  %v1426_v54 = vld [vmem:[#allocation8 + $0xe0] sm:$0xf] }
  0x37   :  { %334 = vmatpush.bf16.msra.mxu0 %v1195_v16  ;;  %v1757_v55 = vld [vmem:[#allocation8 + $0xe4] sm:$0xf0]  ;;  %v1367_v56 = vor.u32 %v1740_v48, %v1364_v49  ;;  %v1739_v57 = vld [vmem:[#allocation8 + $0x54] sm:$0xf0]  ;;  %v1756_v58 = vld [vmem:[#allocation8 + $0xe4] sm:$0xf] }
  0x38   :  { %347 = vmatpush.bf16.msra.mxu1 %v1259_v18  ;;  %v1428_v59 = vld [vmem:[#allocation8 + $0xe8] sm:$0xf0]  ;;  %v1738_v60 = vld [vmem:[#allocation8 + $0x54] sm:$0xf]  ;;  %v1356_v61 = vld [vmem:[#allocation8 + $0x58] sm:$0xf0]  ;;  %v1427_v62 = vor.u32 %v1757_v55, %v1426_v54  ;;  %v1355_v63 = vor.u32 %v1739_v57, %v1354_v53 }
  0x39   :  { %360 = vmatpush.bf16.msra.mxu2 %v1199_v19  ;;  %v1431_v0 = vor.u32 %v1756_v58, %v1428_v59  ;;  %v1346_v1 = vld [vmem:[#allocation8 + $0x40] sm:$0xf]  ;;  %v1418_v2 = vld [vmem:[#allocation8 + $0xd0] sm:$0xf]  ;;  %v1755_v3 = vld [vmem:[#allocation8 + $0xd4] sm:$0xf0]  ;;  %v1359_v4 = vor.u32 %v1738_v60, %v1356_v61 }
  0x3a   :  { %373 = vmatpush.bf16.msra.mxu3 %v1263_v23  ;;  %v1737_v5 = vld [vmem:[#allocation8 + $0x44] sm:$0xf0]  ;;  %v1754_v6 = vld [vmem:[#allocation8 + $0xd4] sm:$0xf]  ;;  %v1420_v7 = vld [vmem:[#allocation8 + $0xd8] sm:$0xf0]  ;;  %v1419_v10 = vor.u32 %v1755_v3, %v1418_v2 }
  0x3b   :  { %335 = vmatpush.bf16.msra.mxu0 %v1187_v30  ;;  %v1736_v8 = vld [vmem:[#allocation8 + $0x44] sm:$0xf]  ;;  %v1348_v9 = vld [vmem:[#allocation8 + $0x48] sm:$0xf0]  ;;  %v1347_v11 = vor.u32 %v1737_v5, %v1346_v1  ;;  %v1423_v12 = vor.u32 %v1754_v6, %v1420_v7  ;;  %v1338_v13 = vld [vmem:[#allocation8 + $0x30] sm:$0xf] }
  0x3c   :  { %348 = vmatpush.bf16.msra.mxu1 %v1251_v34  ;;  %v1410_v14 = vld [vmem:[#allocation8 + $0xc0] sm:$0xf]  ;;  %v1753_v15 = vld [vmem:[#allocation8 + $0xc4] sm:$0xf0]  ;;  %v1351_v16 = vor.u32 %v1736_v8, %v1348_v9  ;;  %v1735_v17 = vld [vmem:[#allocation8 + $0x34] sm:$0xf0] }
  0x3d   :  { %361 = vmatpush.bf16.msra.mxu2 %v1191_v35  ;;  %v1752_v18 = vld [vmem:[#allocation8 + $0xc4] sm:$0xf]  ;;  %v1412_v19 = vld [vmem:[#allocation8 + $0xc8] sm:$0xf0]  ;;  %v1734_v20 = vld [vmem:[#allocation8 + $0x34] sm:$0xf]  ;;  %v1411_v22 = vor.u32 %v1753_v15, %v1410_v14  ;;  %v1339_v23 = vor.u32 %v1735_v17, %v1338_v13 }
  0x3e   :  { %374 = vmatpush.bf16.msra.mxu3 %v1255_v37  ;;  %336 = vmatmul.bf16.vlgmr.msra.gmra.mxu0 %v128_v42  ;;  %v1340_v21 = vld [vmem:[#allocation8 + $0x38] sm:$0xf0]  ;;  %v1415_v24 = vor.u32 %v1752_v18, %v1412_v19  ;;  %v1330_v26 = vld [vmem:[#allocation8 + $0x20] sm:$0xf]  ;;  %v1733_v27 = vld [vmem:[#allocation8 + $0x24] sm:$0xf0] }
  0x3f   :  { %582 = vmatpush.bf16.msrb.mxu0 %v1371_v38  ;;  %349 = vmatmul.bf16.vlgmr.msra.gmra.mxu1 %v129_v47  ;;  %v1343_v25 = vor.u32 %v1734_v20, %v1340_v21  ;;  %v1732_v28 = vld [vmem:[#allocation8 + $0x24] sm:$0xf]  ;;  %v1332_v29 = vld [vmem:[#allocation8 + $0x28] sm:$0xf0]  ;;  %v1331_v30 = vor.u32 %v1733_v27, %v1330_v26  ;;  %v1402_v32 = vld [vmem:[#allocation8 + $0xb0] sm:$0xf] }
  0x40   :  { %362 = vmatmul.bf16.vlgmr.msra.gmra.mxu2 %v128_v42  ;;  %595 = vmatpush.bf16.msrb.mxu1 %v1435_v50  ;;  %v1335_v31 = vor.u32 %v1732_v28, %v1332_v29  ;;  %v1751_v33 = vld [vmem:[#allocation8 + $0xb4] sm:$0xf0]  ;;  %v1750_v34 = vld [vmem:[#allocation8 + $0xb4] sm:$0xf]  ;;  %v1404_v36 = vld [vmem:[#allocation8 + $0xb8] sm:$0xf0] }
  0x41   :  { %608 = vmatpush.bf16.msrb.mxu2 %v1375_v43  ;;  %375 = vmatmul.bf16.vlgmr.msra.gmra.mxu3 %v129_v47  ;;  %v1403_v35 = vor.u32 %v1751_v33, %v1402_v32  ;;  %v1407_v37 = vor.u32 %v1750_v34, %v1404_v36  ;;  %v1322_v38 = vld [vmem:[#allocation8 + $0x10] sm:$0xf]  ;;  %v1731_v39 = vld [vmem:[#allocation8 + $0x14] sm:$0xf0]  ;;  %v1730_v40 = vld [vmem:[#allocation8 + $0x14] sm:$0xf] }
  0x42   :  { %621 = vmatpush.bf16.msrb.mxu3 %v1439_v52  ;;  %v1323_v41 = vor.u32 %v1731_v39, %v1322_v38  ;;  %v1324_v42 = vld [vmem:[#allocation8 + $0x18] sm:$0xf0]  ;;  %v1394_v44 = vld [vmem:[#allocation8 + $0xa0] sm:$0xf]  ;;  %v1749_v45 = vld [vmem:[#allocation8 + $0xa4] sm:$0xf0] }
  0x43   :  { %583 = vmatpush.bf16.msrb.mxu0 %v1363_v51  ;;  %v1327_v43 = vor.u32 %v1730_v40, %v1324_v42  ;;  %v1748_v46 = vld [vmem:[#allocation8 + $0xa4] sm:$0xf]  ;;  %v1395_v47 = vor.u32 %v1749_v45, %v1394_v44  ;;  %v1396_v48 = vld [vmem:[#allocation8 + $0xa8] sm:$0xf0]  ;;  %v1314_v50 = vld [vmem:[#allocation8] sm:$0xf] }
  0x44   :  { %596 = vmatpush.bf16.msrb.mxu1 %v1427_v62  ;;  %v1399_v49 = vor.u32 %v1748_v46, %v1396_v48  ;;  %v1729_v51 = vld [vmem:[#allocation8 + $0x4] sm:$0xf0]  ;;  %v1728_v52 = vld [vmem:[#allocation8 + $0x4] sm:$0xf]  ;;  %v1316_v54 = vld [vmem:[#allocation8 + $0x8] sm:$0xf0] }
  0x45   :  { %609 = vmatpush.bf16.msrb.mxu2 %v1367_v56  ;;  %v1315_v53 = vor.u32 %v1729_v51, %v1314_v50  ;;  %v1319_v55 = vor.u32 %v1728_v52, %v1316_v54  ;;  %v1386_v56 = vld [vmem:[#allocation8 + $0x90] sm:$0xf]  ;;  %v1747_v57 = vld [vmem:[#allocation8 + $0x94] sm:$0xf0]  ;;  %v1746_v59 = vld [vmem:[#allocation8 + $0x94] sm:$0xf] }
  0x46   :  { %622 = vmatpush.bf16.msrb.mxu3 %v1431_v0  ;;  %v1387_v58 = vor.u32 %v1747_v57, %v1386_v56  ;;  %v1388_v60 = vld [vmem:[#allocation8 + $0x98] sm:$0xf0]  ;;  %v1378_v62 = vld [vmem:[#allocation8 + $0x80] sm:$0xf]  ;;  %v1744_v0 = vld [vmem:[#allocation8 + $0x84] sm:$0xf] }
  0x47   :  { %584 = vmatpush.bf16.msrb.mxu0 %v1355_v63  ;;  %v1391_v61 = vor.u32 %v1746_v59, %v1388_v60  ;;  %v1745_v63 = vld [vmem:[#allocation8 + $0x84] sm:$0xf0]  ;;  %v1380_v2 = vld [vmem:[#allocation8 + $0x88] sm:$0xf0]  ;;  %v1775_v5 = vld [vmem:[#allocation10 + $0x74] sm:$0xf0] }
  0x48   :  { %597 = vmatpush.bf16.msrb.mxu1 %v1419_v10  ;;  %v1379_v1 = vor.u32 %v1745_v63, %v1378_v62  ;;  %v1383_v3 = vor.u32 %v1744_v0, %v1380_v2  ;;  %v1774_v6 = vld [vmem:[#allocation10 + $0x74] sm:$0xf]  ;;  %v1500_v8 = vld [vmem:[#allocation10 + $0x78] sm:$0xf0]  ;;  %v1490_v9 = vld [vmem:[#allocation10 + $0x60] sm:$0xf] }
  0x49   :  { %610 = vmatpush.bf16.msrb.mxu2 %v1359_v4  ;;  %v1498_v4 = vld [vmem:[#allocation10 + $0x70] sm:$0xf]  ;;  %v1773_v10 = vld [vmem:[#allocation10 + $0x64] sm:$0xf0]  ;;  %v1492_v13 = vld [vmem:[#allocation10 + $0x68] sm:$0xf0] }
  0x4a   :  { %623 = vmatpush.bf16.msrb.mxu3 %v1423_v12  ;;  %v1499_v7 = vor.u32 %v1775_v5, %v1498_v4  ;;  %v1772_v12 = vld [vmem:[#allocation10 + $0x64] sm:$0xf]  ;;  %v1562_v14 = vld [vmem:[#allocation10 + $0xf0] sm:$0xf]  ;;  %v1491_v15 = vor.u32 %v1773_v10, %v1490_v9  ;;  %v1790_v17 = vld [vmem:[#allocation10 + $0xf4] sm:$0xf] }
  0x4b   :  { %585 = vmatpush.bf16.msrb.mxu0 %v1347_v11  ;;  %v1503_v11 = vor.u32 %v1774_v6, %v1500_v8  ;;  %v1564_v18 = vld [vmem:[#allocation10 + $0xf8] sm:$0xf0]  ;;  %v1495_v19 = vor.u32 %v1772_v12, %v1492_v13  ;;  %v1554_v26 = vld [vmem:[#allocation10 + $0xe0] sm:$0xf]  ;;  %v1789_v27 = vld [vmem:[#allocation10 + $0xe4] sm:$0xf0] }
  0x4c   :  { %598 = vmatpush.bf16.msrb.mxu1 %v1411_v22  ;;  %v1567_v21 = vor.u32 %v1790_v17, %v1564_v18  ;;  %v1482_v22 = vld [vmem:[#allocation10 + $0x50] sm:$0xf]  ;;  %v1555_v28 = vor.u32 %v1789_v27, %v1554_v26  ;;  %v1788_v29 = vld [vmem:[#allocation10 + $0xe4] sm:$0xf]  ;;  %v1474_v33 = vld [vmem:[#allocation10 + $0x40] sm:$0xf] }
  0x4d   :  { %611 = vmatpush.bf16.msrb.mxu2 %v1351_v16  ;;  %v1791_v16 = vld [vmem:[#allocation10 + $0xf4] sm:$0xf0]  ;;  %v1769_v34 = vld [vmem:[#allocation10 + $0x44] sm:$0xf0]  ;;  %v1546_v36 = vld [vmem:[#allocation10 + $0xd0] sm:$0xf] }
  0x4e   :  { %624 = vmatpush.bf16.msrb.mxu3 %v1415_v24  ;;  %v1563_v20 = vor.u32 %v1791_v16, %v1562_v14  ;;  %v1770_v24 = vld [vmem:[#allocation10 + $0x54] sm:$0xf]  ;;  %v1768_v39 = vld [vmem:[#allocation10 + $0x44] sm:$0xf]  ;;  %v1476_v40 = vld [vmem:[#allocation10 + $0x48] sm:$0xf0]  ;;  %v1475_v45 = vor.u32 %v1769_v34, %v1474_v33 }
  0x4f   :  { %586 = vmatpush.bf16.msrb.mxu0 %v1339_v23  ;;  %v1771_v23 = vld [vmem:[#allocation10 + $0x54] sm:$0xf0]  ;;  %v1786_v38 = vld [vmem:[#allocation10 + $0xd4] sm:$0xf]  ;;  %v162_v42 = vld [vmem:[#allocation7] sm:$0x3]  ;;  %v1479_v46 = vor.u32 %v1768_v39, %v1476_v40 }
  0x50   :  { %599 = vmatpush.bf16.msrb.mxu1 %v1403_v35  ;;  %v1767_v48 = vld [vmem:[#allocation10 + $0x34] sm:$0xf0]  ;;  %v1766_v50 = vld [vmem:[#allocation10 + $0x34] sm:$0xf]  ;;  %v1468_v51 = vld [vmem:[#allocation10 + $0x38] sm:$0xf0] }
  0x51   :  { %612 = vmatpush.bf16.msrb.mxu2 %v1343_v25  ;;  %v1484_v25 = vld [vmem:[#allocation10 + $0x58] sm:$0xf0]  ;;  %v1471_v54 = vor.u32 %v1766_v50, %v1468_v51  ;;  %v1785_v8 = vld [vmem:[#allocation10 + $0xc4] sm:$0xf0]  ;;  %v1784_v9 = vld [vmem:[#allocation10 + $0xc4] sm:$0xf] }
  0x52   :  { %625 = vmatpush.bf16.msrb.mxu3 %v1407_v37  ;;  %v1487_v35 = vor.u32 %v1770_v24, %v1484_v25  ;;  %v1787_v37 = vld [vmem:[#allocation10 + $0xd4] sm:$0xf0]  ;;  %v1458_v13 = vld [vmem:[#allocation10 + $0x20] sm:$0xf]  ;;  %v1765_v14 = vld [vmem:[#allocation10 + $0x24] sm:$0xf0] }
  0x53   :  { %587 = vmatpush.bf16.msrb.mxu0 %v1331_v30  ;;  %v1556_v30 = vld [vmem:[#allocation10 + $0xe8] sm:$0xf0]  ;;  %v1459_v16 = vor.u32 %v1765_v14, %v1458_v13  ;;  %v1530_v18 = vld [vmem:[#allocation10 + $0xb0] sm:$0xf]  ;;  %v1763_v26 = vld [vmem:[#allocation10 + $0x14] sm:$0xf0] }
  0x54   :  { %600 = vmatpush.bf16.msrb.mxu1 %v1395_v47  ;;  %v1559_v32 = vor.u32 %v1788_v29, %v1556_v30  ;;  %v1466_v47 = vld [vmem:[#allocation10 + $0x30] sm:$0xf]  ;;  %v1460_v17 = vld [vmem:[#allocation10 + $0x28] sm:$0xf0]  ;;  %v1762_v27 = vld [vmem:[#allocation10 + $0x14] sm:$0xf] }
  0x55   :  { %613 = vmatpush.bf16.msrb.mxu2 %v1335_v31  ;;  %v1483_v31 = vor.u32 %v1771_v23, %v1482_v22  ;;  %v1467_v52 = vor.u32 %v1767_v48, %v1466_v47  ;;  %v1782_v22 = vld [vmem:[#allocation10 + $0xb4] sm:$0xf]  ;;  %v1532_v23 = vld [vmem:[#allocation10 + $0xb8] sm:$0xf0]  ;;  %v1450_v25 = vld [vmem:[#allocation10 + $0x10] sm:$0xf] }
  0x56   :  { %626 = vmatpush.bf16.msrb.mxu3 %v1399_v49  ;;  %v164_v49 = vperm.slane %v162_v42, 0  ;;  %v1535_v24 = vor.u32 %v1782_v22, %v1532_v23  ;;  %v1452_v29 = vld [vmem:[#allocation10 + $0x18] sm:$0xf0]  ;;  %v1780_v33 = vld [vmem:[#allocation10 + $0xa4] sm:$0xf]  ;;  %s1164_s3 = sshll.u32 %s2047_s9, 4  ;;  %s1165_s3 = int_to_ptr.vmem [resolvable:$true] %s1164_s3 }
  0x57   :  { %588 = vmatpush.bf16.msrb.mxu0 %v1323_v41  ;;  %v1548_v41 = vld [vmem:[#allocation10 + $0xd8] sm:$0xf0]  ;;  %v1455_v30 = vor.u32 %v1762_v27, %v1452_v29  ;;  %v1760_v39 = vld [vmem:[#allocation10 + $0x4] sm:$0xf]  ;;  %v1777_v50 = vld [vmem:[#allocation10 + $0x84] sm:$0xf0] }
  0x58   :  { %601 = vmatpush.bf16.msrb.mxu1 %v1387_v58  ;;  %v1551_v44 = vor.u32 %v1786_v38, %v1548_v41  ;;  %v165_v58 = vperm.slane %v162_v42, 1  ;;  %v1761_v38 = vld [vmem:[#allocation10 + $0x4] sm:$0xf0]  ;;  %v1444_v41 = vld [vmem:[#allocation10 + $0x8] sm:$0xf0]  ;;  %s1166_s29 = sshll.u32 %s2158_s10, 4  ;;  %s1167_s29 = int_to_ptr.hbm [resolvable:$true] %s1166_s29 }
  0x59   :  { %614 = vmatpush.bf16.msrb.mxu2 %v1327_v43  ;;  %v1547_v43 = vor.u32 %v1787_v37, %v1546_v36  ;;  %v1442_v37 = vld [vmem:[#allocation10] sm:$0xf]  ;;  %v1447_v42 = vor.u32 %v1760_v39, %v1444_v41  ;;  %v1516_v47 = vld [vmem:[#allocation10 + $0x98] sm:$0xf0]  ;;  %v1776_v51 = vld [vmem:[#allocation10 + $0x84] sm:$0xf] }
  0x5a   :  { %627 = vmatpush.bf16.msrb.mxu3 %v1391_v61  ;;  %v1443_v40 = vor.u32 %v1761_v38, %v1442_v37  ;;  %v1682_v13 = vld [vmem:[#allocation11 + $0xe0] sm:$0xf]  ;;  %v1821_v14 = vld [vmem:[#allocation11 + $0xe4] sm:$0xf0]  ;;  %v1800_v27 = vld [vmem:[#allocation11 + $0x44] sm:$0xf] }
  0x5b   :  { %589 = vmatpush.bf16.msrb.mxu0 %v1315_v53  ;;  %v1801_v22 = vld [vmem:[#allocation11 + $0x44] sm:$0xf0]  ;;  %v1676_v29 = vld [vmem:[#allocation11 + $0xd8] sm:$0xf0]  ;;  %v1799_v37 = vld [vmem:[#allocation11 + $0x34] sm:$0xf0] }
  0x5c   :  { %602 = vmatpush.bf16.msrb.mxu1 %v1379_v1  ;;  %v1798_v38 = vld [vmem:[#allocation11 + $0x34] sm:$0xf]  ;;  %v1596_v39 = vld [vmem:[#allocation11 + $0x38] sm:$0xf0] }
  0x5d   :  { %615 = vmatpush.bf16.msrb.mxu2 %v1319_v55 }
  0x5e   :  { %628 = vmatpush.bf16.msrb.mxu3 %v1383_v3 }
  0x5f   :  { %838 = vmatpush.bf16.msra.mxu0 %v1499_v7  ;;  %v1538_v7 = vld [vmem:[#allocation10 + $0xc0] sm:$0xf] }
  0x60   :  { %851 = vmatpush.bf16.msra.mxu1 %v1563_v20  ;;  %v1539_v10 = vor.u32 %v1785_v8, %v1538_v7 }
  0x61   :  { %864 = vmatpush.bf16.msra.mxu2 %v1503_v11  ;;  %v1540_v11 = vld [vmem:[#allocation10 + $0xc8] sm:$0xf0] }
  0x62   :  { %877 = vmatpush.bf16.msra.mxu3 %v1567_v21  ;;  %v1543_v12 = vor.u32 %v1784_v9, %v1540_v11  ;;  %v1610_v9 = vld [vmem:[#allocation11 + $0x50] sm:$0xf]  ;;  %v1802_v11 = vld [vmem:[#allocation11 + $0x54] sm:$0xf] }
  0x63   :  { %839 = vmatpush.bf16.msra.mxu0 %v1491_v15  ;;  %v1764_v15 = vld [vmem:[#allocation10 + $0x24] sm:$0xf] }
  0x64   :  { %852 = vmatpush.bf16.msra.mxu1 %v1555_v28  ;;  %v1463_v20 = vor.u32 %v1764_v15, %v1460_v17  ;;  %v1451_v28 = vor.u32 %v1763_v26, %v1450_v25  ;;  %v1683_v15 = vor.u32 %v1821_v14, %v1682_v13  ;;  %v1684_v17 = vld [vmem:[#allocation11 + $0xe8] sm:$0xf0]  ;;  %v1819_v25 = vld [vmem:[#allocation11 + $0xd4] sm:$0xf0]  ;;  %v1818_v26 = vld [vmem:[#allocation11 + $0xd4] sm:$0xf] }
  0x65   :  { %865 = vmatpush.bf16.msra.mxu2 %v1495_v19  ;;  %v1783_v19 = vld [vmem:[#allocation10 + $0xb4] sm:$0xf0]  ;;  %v1794_v14 = vld [vmem:[#allocation11 + $0x14] sm:$0xf] }
  0x66   :  { %878 = vmatpush.bf16.msra.mxu3 %v1559_v32  ;;  %v1531_v21 = vor.u32 %v1783_v19, %v1530_v18  ;;  %v1781_v32 = vld [vmem:[#allocation10 + $0xa4] sm:$0xf0]  ;;  %v416_v18 = vld [vmem:[%s2152_s4] sm:$0x3]  ;;  %v1795_v13 = vld [vmem:[#allocation11 + $0x14] sm:$0xf0] }
  0x67   :  { %840 = vmatpush.bf16.msra.mxu0 %v1483_v31  ;;  %v1522_v31 = vld [vmem:[#allocation10 + $0xa0] sm:$0xf] }
  0x68   :  { %853 = vmatpush.bf16.msra.mxu1 %v1547_v43  ;;  %v1523_v34 = vor.u32 %v1781_v32, %v1522_v31  ;;  %v1514_v43 = vld [vmem:[#allocation10 + $0x90] sm:$0xf]  ;;  %v1679_v31 = vor.u32 %v1818_v26, %v1676_v29  ;;  %v418_v32 = vperm.slane %v416_v18, 0  ;;  %v1792_v26 = vld [vmem:[#allocation11 + $0x4] sm:$0xf] }
  0x69   :  { %866 = vmatpush.bf16.msra.mxu2 %v1487_v35  ;;  %v1524_v35 = vld [vmem:[#allocation10 + $0xa8] sm:$0xf0] }
  0x6a   :  { %879 = vmatpush.bf16.msra.mxu3 %v1551_v44  ;;  %v1527_v36 = vor.u32 %v1780_v33, %v1524_v35  ;;  %v1779_v44 = vld [vmem:[#allocation10 + $0x94] sm:$0xf0] }
  0x6b   :  { %841 = vmatpush.bf16.msra.mxu0 %v1475_v45  ;;  %v1515_v45 = vor.u32 %v1779_v44, %v1514_v43  ;;  %v419_v43 = vperm.slane %v416_v18, 1  ;;  %v1650_v18 = vld [vmem:[#allocation11 + $0xa0] sm:$0xf] }
  0x6c   :  { %854 = vmatpush.bf16.msra.mxu1 %v1539_v10  ;;  %v1803_v10 = vld [vmem:[#allocation11 + $0x54] sm:$0xf0] }
  0x6d   :  { %867 = vmatpush.bf16.msra.mxu2 %v1479_v46  ;;  %v1778_v46 = vld [vmem:[#allocation10 + $0x94] sm:$0xf]  ;;  %v1611_v19 = vor.u32 %v1803_v10, %v1610_v9  ;;  %v1660_v10 = vld [vmem:[#allocation11 + $0xb8] sm:$0xf0] }
  0x6e   :  { %880 = vmatpush.bf16.msra.mxu3 %v1543_v12  ;;  %v1519_v48 = vor.u32 %v1778_v46, %v1516_v47  ;;  %v1612_v12 = vld [vmem:[#allocation11 + $0x58] sm:$0xf0]  ;;  %v1814_v9 = vld [vmem:[#allocation11 + $0xb4] sm:$0xf] }
  0x6f   :  { %842 = vmatpush.bf16.msra.mxu0 %v1467_v52  ;;  %v1615_v23 = vor.u32 %v1802_v11, %v1612_v12  ;;  %v1663_v11 = vor.u32 %v1814_v9, %v1660_v10  ;;  %v1578_v12 = vld [vmem:[#allocation11 + $0x10] sm:$0xf] }
  0x70   :  { %855 = vmatpush.bf16.msra.mxu1 %v1531_v21  ;;  %v1602_v21 = vld [vmem:[#allocation11 + $0x40] sm:$0xf] }
  0x71   :  { %868 = vmatpush.bf16.msra.mxu2 %v1471_v54 }
  0x72   :  { %881 = vmatpush.bf16.msra.mxu3 %v1535_v24  ;;  %v1674_v24 = vld [vmem:[#allocation11 + $0xd0] sm:$0xf] }
  0x73   :  { %843 = vmatpush.bf16.msra.mxu0 %v1459_v16  ;;  %v1820_v16 = vld [vmem:[#allocation11 + $0xe4] sm:$0xf] }
  0x74   :  { %856 = vmatpush.bf16.msra.mxu1 %v1523_v34  ;;  %v1603_v34 = vor.u32 %v1801_v22, %v1602_v21  ;;  %v1812_v21 = vld [vmem:[#allocation11 + $0xa4] sm:$0xf]  ;;  %v1652_v22 = vld [vmem:[#allocation11 + $0xa8] sm:$0xf0] }
  0x75   :  { %869 = vmatpush.bf16.msra.mxu2 %v1463_v20  ;;  %v1687_v20 = vor.u32 %v1820_v16, %v1684_v17  ;;  %v1580_v16 = vld [vmem:[#allocation11 + $0x18] sm:$0xf0] }
  0x76   :  { %882 = vmatpush.bf16.msra.mxu3 %v1527_v36  ;;  %v1594_v36 = vld [vmem:[#allocation11 + $0x30] sm:$0xf]  ;;  %v1583_v17 = vor.u32 %v1794_v14, %v1580_v16 }
  0x77   :  { %844 = vmatpush.bf16.msra.mxu0 %v1451_v28  ;;  %v1604_v28 = vld [vmem:[#allocation11 + $0x48] sm:$0xf0]  ;;  %v1595_v41 = vor.u32 %v1799_v37, %v1594_v36  ;;  %v1634_v36 = vld [vmem:[#allocation11 + $0x80] sm:$0xf]  ;;  %v1809_v37 = vld [vmem:[#allocation11 + $0x84] sm:$0xf0] }
  0x78   :  { %857 = vmatpush.bf16.msra.mxu1 %v1515_v45  ;;  %v1607_v35 = vor.u32 %v1800_v27, %v1604_v28  ;;  %v1572_v28 = vld [vmem:[#allocation11 + $0x8] sm:$0xf0] }
  0x79   :  { %870 = vmatpush.bf16.msra.mxu2 %v1455_v30  ;;  %v1675_v30 = vor.u32 %v1819_v25, %v1674_v24  ;;  %v1570_v24 = vld [vmem:[#allocation11] sm:$0xf]  ;;  %v1793_v25 = vld [vmem:[#allocation11 + $0x4] sm:$0xf0]  ;;  %v1575_v29 = vor.u32 %v1792_v26, %v1572_v28 }
  0x7a   :  { %883 = vmatpush.bf16.msra.mxu3 %v1519_v48  ;;  %v1571_v27 = vor.u32 %v1793_v25, %v1570_v24 }
  0x7b   :  { %845 = vmatpush.bf16.msra.mxu0 %v1443_v40 }
  0x7d   :  { %871 = vmatpush.bf16.msra.mxu2 %v1447_v42  ;;  %v1599_v42 = vor.u32 %v1798_v38, %v1596_v39  ;;  %v1808_v38 = vld [vmem:[#allocation11 + $0x84] sm:$0xf]  ;;  %v1635_v39 = vor.u32 %v1809_v37, %v1634_v36 }
  0xbb   :  { %v337_v53 = vpop.f32.mrf.mxu0 }
  0xbc   :  { %v338_v55 = vadd.f32 %v337_v53, %v164_v49  ;;  %v350_v56 = vpop.f32.mrf.mxu1  ;;  %v1506_v49 = vld [vmem:[#allocation10 + $0x80] sm:$0xf]  ;;  %v1508_v53 = vld [vmem:[#allocation10 + $0x88] sm:$0xf0] }
  0xbd   :  { %v1507_v52 = vor.u32 %v1777_v50, %v1506_v49  ;;  %v1511_v54 = vor.u32 %v1776_v51, %v1508_v53 }
  0xbe   :  { %v351_v57 = vadd.f32 %v350_v56, %v338_v55  ;;  %v1626_v55 = vld [vmem:[#allocation11 + $0x70] sm:$0xf]  ;;  %v1807_v56 = vld [vmem:[#allocation11 + $0x74] sm:$0xf0] }
  0xbf   :  { %858 = vmatpush.bf16.msra.mxu1 %v1507_v52  ;;  %884 = vmatpush.bf16.msra.mxu3 %v1511_v54 }
  0xc0   :  { %v380_v59 = vmax.f32 %v351_v57, 0.0  ;;  %v1806_v57 = vld [vmem:[#allocation11 + $0x74] sm:$0xf] }
  0xc2   :  { %v382_v60 = vpack.c.bf16 %v380_v59, %v380_v59  ;;  %v1628_v59 = vld [vmem:[#allocation11 + $0x78] sm:$0xf0] }
  0xc3   :  { %v363_v61 = vpop.f32.mrf.mxu2  ;;  %v339_v0 = vpop.f32.mrf.mxu0 }
  0xc4   :  { %v364_v62 = vadd.f32 %v363_v61, %v165_v58  ;;  %v376_v63 = vpop.f32.mrf.mxu3  ;;  %v352_v1 = vpop.f32.mrf.mxu1  ;;  %590 = vmatmul.bf16.vlgmr.msrb.gmra.mxu0 %v382_v60  ;;  %616 = vmatmul.bf16.vlgmr.msrb.gmra.mxu2 %v382_v60  ;;  %v1627_v58 = vor.u32 %v1807_v56, %v1626_v55  ;;  %v1618_v60 = vld [vmem:[#allocation11 + $0x60] sm:$0xf]  ;;  %v1805_v61 = vld [vmem:[#allocation11 + $0x64] sm:$0xf0]  ;;  %v1620_v0 = vld [vmem:[#allocation11 + $0x68] sm:$0xf0] }
  0xc5   :  { %v1690_v1 = vld [vmem:[#allocation11 + $0xf0] sm:$0xf] }
  0xc6   :  { %v377_v2 = vadd.f32 %v376_v63, %v364_v62  ;;  %v1631_v62 = vor.u32 %v1806_v57, %v1628_v59  ;;  %v1804_v63 = vld [vmem:[#allocation11 + $0x64] sm:$0xf]  ;;  %1092 = vmatpush.bf16.msrb.mxu0 %v1627_v58  ;;  %v1666_v58 = vld [vmem:[#allocation11 + $0xc0] sm:$0xf]  ;;  %v1817_v59 = vld [vmem:[#allocation11 + $0xc4] sm:$0xf0] }
  0xc8   :  { %v381_v3 = vmax.f32 %v377_v2, 0.0  ;;  %v1619_v2 = vor.u32 %v1805_v61, %v1618_v60  ;;  %1118 = vmatpush.bf16.msrb.mxu2 %v1631_v62  ;;  %v1816_v60 = vld [vmem:[#allocation11 + $0xc4] sm:$0xf]  ;;  %v1667_v61 = vor.u32 %v1817_v59, %v1666_v58  ;;  %v1668_v62 = vld [vmem:[#allocation11 + $0xc8] sm:$0xf0] }
  0xca   :  { %v383_v4 = vpack.c.bf16 %v381_v3, %v381_v3  ;;  %v1823_v3 = vld [vmem:[#allocation11 + $0xf4] sm:$0xf0]  ;;  %1093 = vmatpush.bf16.msrb.mxu0 %v1619_v2  ;;  %v1796_v2 = vld [vmem:[#allocation11 + $0x24] sm:$0xf] }
  0xcb   :  { %v365_v5 = vpop.f32.mrf.mxu2  ;;  %v1691_v7 = vor.u32 %v1823_v3, %v1690_v1  ;;  %v1797_v1 = vld [vmem:[#allocation11 + $0x24] sm:$0xf0] }
  0xcc   :  { %v378_v6 = vpop.f32.mrf.mxu3  ;;  %603 = vmatmul.bf16.vlgmr.msrb.gmra.mxu1 %v383_v4  ;;  %629 = vmatmul.bf16.vlgmr.msrb.gmra.mxu3 %v383_v4  ;;  %v1822_v4 = vld [vmem:[#allocation11 + $0xf4] sm:$0xf]  ;;  %v1692_v5 = vld [vmem:[#allocation11 + $0xf8] sm:$0xf0] }
  0xcd   :  { %v1623_v6 = vor.u32 %v1804_v63, %v1620_v0  ;;  %v1695_v8 = vor.u32 %v1822_v4, %v1692_v5  ;;  %1105 = vmatpush.bf16.msrb.mxu1 %v1691_v7  ;;  %v1671_v63 = vor.u32 %v1816_v60, %v1668_v62  ;;  %v1586_v0 = vld [vmem:[#allocation11 + $0x20] sm:$0xf]  ;;  %v1588_v4 = vld [vmem:[#allocation11 + $0x28] sm:$0xf0]  ;;  %v1658_v5 = vld [vmem:[#allocation11 + $0xb0] sm:$0xf] }
  0xce   :  { %1094 = vmatpush.bf16.msrb.mxu0 %v1611_v19  ;;  %v1587_v3 = vor.u32 %v1797_v1, %v1586_v0  ;;  %v1591_v7 = vor.u32 %v1796_v2, %v1588_v4  ;;  %v1813_v19 = vld [vmem:[#allocation11 + $0xa4] sm:$0xf0] }
  0xcf   :  { %1131 = vmatpush.bf16.msrb.mxu3 %v1695_v8  ;;  %1119 = vmatpush.bf16.msrb.mxu2 %v1623_v6  ;;  %v1815_v6 = vld [vmem:[#allocation11 + $0xb4] sm:$0xf0] }
  0xd0   :  { %v1659_v8 = vor.u32 %v1815_v6, %v1658_v5 }
  0xd1   :  { %1106 = vmatpush.bf16.msrb.mxu1 %v1683_v15  ;;  %v1579_v15 = vor.u32 %v1795_v13, %v1578_v12 }
  0xd2   :  { %1095 = vmatpush.bf16.msrb.mxu0 %v1603_v34  ;;  %v1644_v34 = vld [vmem:[#allocation11 + $0x98] sm:$0xf0] }
  0xd3   :  { %1132 = vmatpush.bf16.msrb.mxu3 %v1687_v20  ;;  %1120 = vmatpush.bf16.msrb.mxu2 %v1615_v23  ;;  %v1651_v20 = vor.u32 %v1813_v19, %v1650_v18  ;;  %v1655_v23 = vor.u32 %v1812_v21, %v1652_v22 }
  0xd5   :  { %1107 = vmatpush.bf16.msrb.mxu1 %v1675_v30  ;;  %v1642_v30 = vld [vmem:[#allocation11 + $0x90] sm:$0xf] }
  0xd6   :  { %1096 = vmatpush.bf16.msrb.mxu0 %v1595_v41 }
  0xd7   :  { %1133 = vmatpush.bf16.msrb.mxu3 %v1679_v31  ;;  %1121 = vmatpush.bf16.msrb.mxu2 %v1607_v35  ;;  %v1811_v31 = vld [vmem:[#allocation11 + $0x94] sm:$0xf0] }
  0xd9   :  { %1108 = vmatpush.bf16.msrb.mxu1 %v1667_v61  ;;  %v926_v61 = vld [vmem:[%s2156_s8] sm:$0x3] }
  0xda   :  { %1097 = vmatpush.bf16.msrb.mxu0 %v1587_v3  ;;  %v929_v4 = vperm.slane %v926_v61, 1 }
  0xdb   :  { %1122 = vmatpush.bf16.msrb.mxu2 %v1599_v42  ;;  %1134 = vmatpush.bf16.msrb.mxu3 %v1671_v63  ;;  %v672_v42 = vld [vmem:[%s2154_s6] sm:$0x3]  ;;  %s2046_s6 = smov [#allocation13]   ;;  %v928_v63 = vperm.slane %v926_v61, 0 }
  0xdc   :  { %s1153_s22 = sshll.u32 %s2046_s6, 4  ;;  %s1154_s22 = int_to_ptr.vmem [resolvable:$true] %s1153_s22 }
  0xdd   :  { %1109 = vmatpush.bf16.msrb.mxu1 %v1659_v8 }
  0xde   :  { %1098 = vmatpush.bf16.msrb.mxu0 %v1579_v15 }
  0xdf   :  { %1123 = vmatpush.bf16.msrb.mxu2 %v1591_v7  ;;  %1135 = vmatpush.bf16.msrb.mxu3 %v1663_v11 }
  0xe1   :  { %1110 = vmatpush.bf16.msrb.mxu1 %v1651_v20 }
  0xe2   :  { %1099 = vmatpush.bf16.msrb.mxu0 %v1571_v27 }
  0xe3   :  { %1124 = vmatpush.bf16.msrb.mxu2 %v1583_v17  ;;  %1136 = vmatpush.bf16.msrb.mxu3 %v1655_v23 }
  0xe7   :  { %1125 = vmatpush.bf16.msrb.mxu2 %v1575_v29 }
 0x141   :  { %v591_v33 = vpop.f32.mrf.mxu0 }
 0x142   :  { %v592_v40 = vadd.f32 %v591_v33, %v418_v32  ;;  %v1810_v32 = vld [vmem:[#allocation11 + $0x94] sm:$0xf]  ;;  %v1643_v33 = vor.u32 %v1811_v31, %v1642_v30 }
 0x143   :  { %v1647_v35 = vor.u32 %v1810_v32, %v1644_v34 }
 0x144   :  { %1111 = vmatpush.bf16.msrb.mxu1 %v1643_v33 }
 0x145   :  { %1137 = vmatpush.bf16.msrb.mxu3 %v1647_v35 }
 0x147   :  { %v617_v44 = vpop.f32.mrf.mxu2 }
 0x148   :  { %v618_v49 = vadd.f32 %v617_v44, %v419_v43  ;;  %1112 = vmatpush.bf16.msrb.mxu1 %v1635_v39  ;;  %v674_v44 = vperm.slane %v672_v42, 0 }
 0x149   :  { %v604_v45 = vpop.f32.mrf.mxu1  ;;  %v593_v47 = vpop.f32.mrf.mxu0 }
 0x14a   :  { %v605_v46 = vadd.f32 %v604_v45, %v592_v40  ;;  %v1636_v40 = vld [vmem:[#allocation11 + $0x88] sm:$0xf0] }
 0x14b   :  { %v1639_v41 = vor.u32 %v1808_v38, %v1636_v40 }
 0x14c   :  { %v634_v48 = vmax.f32 %v605_v46, 0.0 }
 0x14d   :  { %1138 = vmatpush.bf16.msrb.mxu3 %v1639_v41 }
 0x14e   :  { %636 = vst [vmem:[#allocation13] sm:$0xff] %v634_v48  ;;  %v638_v50 = vpack.c.bf16 %v634_v48, %v634_v48 }
 0x14f   :  { %v630_v51 = vpop.f32.mrf.mxu3  ;;  %v619_v53 = vpop.f32.mrf.mxu2 }
 0x150   :  { %v631_v52 = vadd.f32 %v630_v51, %v618_v49  ;;  %846 = vmatmul.bf16.vlgmr.msra.gmra.mxu0 %v638_v50  ;;  %872 = vmatmul.bf16.vlgmr.msra.gmra.mxu2 %v638_v50  ;;  %v675_v49 = vperm.slane %v672_v42, 1 }
 0x151   :  { %v606_v54 = vpop.f32.mrf.mxu1 }
 0x152   :  { %v635_v55 = vmax.f32 %v631_v52, 0.0 }
 0x154   :  { %637 = vst [vmem:[#allocation13 + $0x8] sm:$0xff] %v635_v55  ;;  %v639_v56 = vpack.c.bf16 %v635_v55, %v635_v55 }
 0x155   :  { %1158 = dma.vmem_to_hbm [thread:$0]  %s1154_s22, 256, %s1156_s25, [#allocation4]  }
 0x156   :  { %859 = vmatmul.bf16.vlgmr.msra.gmra.mxu1 %v639_v56  ;;  %885 = vmatmul.bf16.vlgmr.msra.gmra.mxu3 %v639_v56 }
 0x157   :  { %v632_v57 = vpop.f32.mrf.mxu3 }
 0x1cd   :  { %v847_v43 = vpop.f32.mrf.mxu0 }
 0x1ce   :  { %v848_v45 = vadd.f32 %v847_v43, %v674_v44 }
 0x1d3   :  { %v860_v46 = vpop.f32.mrf.mxu1  ;;  %v873_v47 = vpop.f32.mrf.mxu2 }
 0x1d4   :  { %v861_v48 = vadd.f32 %v860_v46, %v848_v45  ;;  %v874_v53 = vadd.f32 %v873_v47, %v675_v49 }
 0x1d5   :  { %v849_v50 = vpop.f32.mrf.mxu0 }
 0x1d6   :  { %v890_v51 = vmax.f32 %v861_v48, 0.0 }
 0x1d8   :  { %v892_v52 = vpack.c.bf16 %v890_v51, %v890_v51 }
 0x1d9   :  { %v886_v54 = vpop.f32.mrf.mxu3 }
 0x1da   :  { %v887_v55 = vadd.f32 %v886_v54, %v874_v53  ;;  %1100 = vmatmul.bf16.vlgmr.msrb.gmra.mxu0 %v892_v52  ;;  %1126 = vmatmul.bf16.vlgmr.msrb.gmra.mxu2 %v892_v52 }
 0x1db   :  { %v862_v56 = vpop.f32.mrf.mxu1  ;;  %v875_v57 = vpop.f32.mrf.mxu2 }
 0x1dc   :  { %v891_v58 = vmax.f32 %v887_v55, 0.0 }
 0x1de   :  { %v893_v59 = vpack.c.bf16 %v891_v58, %v891_v58 }
 0x1e0   :  { %1113 = vmatmul.bf16.vlgmr.msrb.gmra.mxu1 %v893_v59  ;;  %1139 = vmatmul.bf16.vlgmr.msrb.gmra.mxu3 %v893_v59 }
 0x1e1   :  { %v888_v60 = vpop.f32.mrf.mxu3 }
 0x257   :  { %v1101_v62 = vpop.f32.mrf.mxu0 }
 0x258   :  { %v1102_v0 = vadd.f32 %v1101_v62, %v928_v63 }
 0x25d   :  { %v1114_v1 = vpop.f32.mrf.mxu1  ;;  %v1127_v2 = vpop.f32.mrf.mxu2 }
 0x25e   :  { %v1115_v3 = vadd.f32 %v1114_v1, %v1102_v0  ;;  %v1128_v7 = vadd.f32 %v1127_v2, %v929_v4 }
 0x25f   :  { %v1103_v5 = vpop.f32.mrf.mxu0 }
 0x260   :  { %v1144_v6 = vmax.f32 %v1115_v3, 0.0 }
 0x262   :  { %1146 = vst [vmem:[#allocation14] sm:$0xff] %v1144_v6 }
 0x263   :  { %v1140_v8 = vpop.f32.mrf.mxu3 }
 0x264   :  { %v1141_v9 = vadd.f32 %v1140_v8, %v1128_v7 }
 0x265   :  { %v1116_v10 = vpop.f32.mrf.mxu1  ;;  %v1129_v11 = vpop.f32.mrf.mxu2 }
 0x266   :  { %v1145_v12 = vmax.f32 %v1141_v9, 0.0 }
 0x268   :  { %1147 = vst [vmem:[#allocation14 + $0x8] sm:$0xff] %v1145_v12 }
 0x269   :  { %1169 = dma.vmem_to_hbm [thread:$0]  %s1165_s3, 256, %s1167_s29, [#allocation15]  }
 0x26b   :  { %v1142_v13 = vpop.f32.mrf.mxu3 }
 0x26c   :  { %2034 = dma.done.wait [#allocation4], 256  }
 0x26d   :  { %2035 = vsyncadd [#allocation4], 4294967040 }
 0x26e   :  { %2036 = dma.done.wait [#allocation15], 256  }
 0x26f   :  { %2037 = vsyncadd [#allocation15], 4294967040 }
 0x270   :  { %1178 = vsyncpa [#allocation3], 1 }
 0x271   :  { %1179 = vsyncpa [#allocation6], 1 }
 0x272   :  { %1180 = vsyncpa [#allocation9], 1 }
 0x273   :  { %1181 = vsyncpa [#allocation12], 1 }
 0x274   :  { %1182 = vsyncpa [#allocation4], 1 }
 0x275   :  { %1183 = vsyncpa [#allocation15], 1 }

// kernel: _tiled_linear_relu.1
= control target key start
LH: loop header
LB: loop body
LE: loop exit
PB: predicated region body
PF: predicated region fallthrough
CT: control target
= control target key end

     0   :  { %8 = vsyncpa [#allocation4], 0  ;;  %s659_s0 = inlined_call_operand.hbm [shape: f32[8,256], index: 0, kind: input, shape index: {}]   ;;  %s660_s1 = inlined_call_operand.hbm [shape: bf16[256,256], index: 1, kind: input, shape index: {}]   ;;  %s661_s2 = inlined_call_operand.hbm [shape: f32[1,256], index: 2, kind: input, shape index: {}]   ;;  %s662_s3 = inlined_call_operand.hbm [shape: f32[8,256], index: 3, kind: output, shape index: {}]  }
   0x1   :  { %9 = vsyncpa [#allocation7], 0  ;;  %s26_s14 = sshll.u32 %s660_s1, 4  ;;  %s27_s14 = int_to_ptr.hbm [resolvable:$true] %s26_s14 }
   0x2   :  { %10 = vsyncpa [#allocation5], 0  ;;  %s621_s15 = smov [#allocation6]   ;;  %s16_s19 = sshll.u32 %s659_s0, 4  ;;  %s17_s19 = int_to_ptr.hbm [resolvable:$true] %s16_s19 }
   0x3   :  { %s28_s16 = sshll.u32 %s621_s15, 4  ;;  %s622_s20 = smov 128   ;;  %s29_s16 = int_to_ptr.vmem [resolvable:$true] %s28_s16 }
   0x4   :  { %s623_s21 = smov 8   ;;  %s624_s22 = smov [#allocation3]  }
   0x5   :  { %34 = dma.hbm_to_vmem [thread:$0]  %s27_s14, 4096, %s29_s16, [#allocation7], %s622_s20, %s622_s20, %s623_s21  }
   0x6   :  { %s18_s23 = sshll.u32 %s624_s22, 4  ;;  %s40_s26 = sshll.u32 %s661_s2, 4  ;;  %s19_s23 = int_to_ptr.vmem [resolvable:$true] %s18_s23  ;;  %s41_s26 = int_to_ptr.hbm [resolvable:$true] %s40_s26 }
   0x7   :  { %21 = dma.hbm_to_vmem [thread:$0]  %s17_s19, 256, %s19_s23, [#allocation4]  }
   0x8   :  { %s625_s1 = smov [#allocation8]  }
   0x9   :  { %s42_s27 = sshll.u32 %s625_s1, 4  ;;  %s43_s27 = int_to_ptr.vmem [resolvable:$true] %s42_s27 }
   0xa   :  { %45 = dma.hbm_to_vmem [thread:$0]  %s41_s26, 32, %s43_s27, [#allocation7]  }
   0xb   :  { %615 = dma.done.wait [#allocation4], 256  }
   0xc   :  { %616 = vsyncadd [#allocation4], 4294967040 }
   0xd   :  { %617 = dma.done.wait [#allocation7], 4128  }
   0xe   :  { %618 = vsyncadd [#allocation7], 4294963168  ;;  %v411_v0 = vld [vmem:[#allocation6 + $0x70] sm:$0xf]  ;;  %v496_v1 = vld [vmem:[#allocation6 + $0x74] sm:$0xf0] }
   0xf   :  { %v475_v2 = vld [vmem:[#allocation6 + $0xf0] sm:$0xf]  ;;  %v412_v3 = vor.u32 %v496_v1, %v411_v0  ;;  %v512_v4 = vld [vmem:[#allocation6 + $0xf4] sm:$0xf0]  ;;  %v495_v5 = vld [vmem:[#allocation6 + $0x74] sm:$0xf] }
  0x10   :  { %v413_v6 = vld [vmem:[#allocation6 + $0x78] sm:$0xf0]  ;;  %v476_v7 = vor.u32 %v512_v4, %v475_v2  ;;  %v511_v9 = vld [vmem:[#allocation6 + $0xf4] sm:$0xf]  ;;  %v403_v11 = vld [vmem:[#allocation6 + $0x60] sm:$0xf] }
  0x11   :  { %v416_v8 = vor.u32 %v495_v5, %v413_v6  ;;  %v477_v10 = vld [vmem:[#allocation6 + $0xf8] sm:$0xf0]  ;;  %262 = vmatpush.bf16.msra.mxu0 %v412_v3  ;;  %v494_v13 = vld [vmem:[#allocation6 + $0x64] sm:$0xf0]  ;;  %v467_v14 = vld [vmem:[#allocation6 + $0xe0] sm:$0xf] }
  0x12   :  { %v480_v12 = vor.u32 %v511_v9, %v477_v10  ;;  %v510_v15 = vld [vmem:[#allocation6 + $0xe4] sm:$0xf0]  ;;  %275 = vmatpush.bf16.msra.mxu1 %v476_v7  ;;  %v404_v16 = vor.u32 %v494_v13, %v403_v11  ;;  %v493_v18 = vld [vmem:[#allocation6 + $0x64] sm:$0xf]  ;;  %v405_v19 = vld [vmem:[#allocation6 + $0x68] sm:$0xf0] }
  0x13   :  { %288 = vmatpush.bf16.msra.mxu2 %v416_v8  ;;  %v468_v17 = vor.u32 %v510_v15, %v467_v14  ;;  %v509_v20 = vld [vmem:[#allocation6 + $0xe4] sm:$0xf]  ;;  %v408_v21 = vor.u32 %v493_v18, %v405_v19  ;;  %v469_v22 = vld [vmem:[#allocation6 + $0xe8] sm:$0xf0]  ;;  %v395_v23 = vld [vmem:[#allocation6 + $0x50] sm:$0xf] }
  0x14   :  { %301 = vmatpush.bf16.msra.mxu3 %v480_v12  ;;  %v492_v24 = vld [vmem:[#allocation6 + $0x54] sm:$0xf0]  ;;  %v472_v25 = vor.u32 %v509_v20, %v469_v22  ;;  %v459_v26 = vld [vmem:[#allocation6 + $0xd0] sm:$0xf]  ;;  %v491_v28 = vld [vmem:[#allocation6 + $0x54] sm:$0xf] }
  0x15   :  { %v508_v27 = vld [vmem:[#allocation6 + $0xd4] sm:$0xf0]  ;;  %263 = vmatpush.bf16.msra.mxu0 %v404_v16  ;;  %v396_v29 = vor.u32 %v492_v24, %v395_v23  ;;  %v397_v30 = vld [vmem:[#allocation6 + $0x58] sm:$0xf0]  ;;  %v507_v31 = vld [vmem:[#allocation6 + $0xd4] sm:$0xf] }
  0x16   :  { %v461_v32 = vld [vmem:[#allocation6 + $0xd8] sm:$0xf0]  ;;  %276 = vmatpush.bf16.msra.mxu1 %v468_v17  ;;  %v460_v33 = vor.u32 %v508_v27, %v459_v26  ;;  %v400_v34 = vor.u32 %v491_v28, %v397_v30  ;;  %v387_v35 = vld [vmem:[#allocation6 + $0x40] sm:$0xf]  ;;  %v490_v36 = vld [vmem:[#allocation6 + $0x44] sm:$0xf0] }
  0x17   :  { %289 = vmatpush.bf16.msra.mxu2 %v408_v21  ;;  %v451_v37 = vld [vmem:[#allocation6 + $0xc0] sm:$0xf]  ;;  %v464_v38 = vor.u32 %v507_v31, %v461_v32  ;;  %v506_v39 = vld [vmem:[#allocation6 + $0xc4] sm:$0xf0]  ;;  %v489_v40 = vld [vmem:[#allocation6 + $0x44] sm:$0xf]  ;;  %v388_v44 = vor.u32 %v490_v36, %v387_v35 }
  0x18   :  { %302 = vmatpush.bf16.msra.mxu3 %v472_v25  ;;  %v389_v41 = vld [vmem:[#allocation6 + $0x48] sm:$0xf0]  ;;  %v505_v42 = vld [vmem:[#allocation6 + $0xc4] sm:$0xf]  ;;  %v452_v45 = vor.u32 %v506_v39, %v451_v37  ;;  %v379_v47 = vld [vmem:[#allocation6 + $0x30] sm:$0xf] }
  0x19   :  { %v453_v43 = vld [vmem:[#allocation6 + $0xc8] sm:$0xf0]  ;;  %264 = vmatpush.bf16.msra.mxu0 %v396_v29  ;;  %v392_v46 = vor.u32 %v489_v40, %v389_v41  ;;  %v488_v48 = vld [vmem:[#allocation6 + $0x34] sm:$0xf0]  ;;  %v443_v49 = vld [vmem:[#allocation6 + $0xb0] sm:$0xf] }
  0x1a   :  { %277 = vmatpush.bf16.msra.mxu1 %v460_v33  ;;  %v456_v50 = vor.u32 %v505_v42, %v453_v43  ;;  %v504_v51 = vld [vmem:[#allocation6 + $0xb4] sm:$0xf0]  ;;  %v487_v52 = vld [vmem:[#allocation6 + $0x34] sm:$0xf]  ;;  %v381_v53 = vld [vmem:[#allocation6 + $0x38] sm:$0xf0]  ;;  %v380_v56 = vor.u32 %v488_v48, %v379_v47 }
  0x1b   :  { %290 = vmatpush.bf16.msra.mxu2 %v400_v34  ;;  %v503_v54 = vld [vmem:[#allocation6 + $0xb4] sm:$0xf]  ;;  %v445_v55 = vld [vmem:[#allocation6 + $0xb8] sm:$0xf0]  ;;  %v444_v57 = vor.u32 %v504_v51, %v443_v49  ;;  %v384_v58 = vor.u32 %v487_v52, %v381_v53  ;;  %v371_v59 = vld [vmem:[#allocation6 + $0x20] sm:$0xf] }
  0x1c   :  { %303 = vmatpush.bf16.msra.mxu3 %v464_v38  ;;  %v486_v60 = vld [vmem:[#allocation6 + $0x24] sm:$0xf0]  ;;  %v435_v61 = vld [vmem:[#allocation6 + $0xa0] sm:$0xf]  ;;  %v448_v62 = vor.u32 %v503_v54, %v445_v55  ;;  %v485_v0 = vld [vmem:[#allocation6 + $0x24] sm:$0xf] }
  0x1d   :  { %265 = vmatpush.bf16.msra.mxu0 %v388_v44  ;;  %v502_v63 = vld [vmem:[#allocation6 + $0xa4] sm:$0xf0]  ;;  %v373_v1 = vld [vmem:[#allocation6 + $0x28] sm:$0xf0]  ;;  %v501_v2 = vld [vmem:[#allocation6 + $0xa4] sm:$0xf]  ;;  %v372_v4 = vor.u32 %v486_v60, %v371_v59 }
  0x1e   :  { %278 = vmatpush.bf16.msra.mxu1 %v452_v45  ;;  %v437_v3 = vld [vmem:[#allocation6 + $0xa8] sm:$0xf0]  ;;  %v436_v5 = vor.u32 %v502_v63, %v435_v61  ;;  %v376_v6 = vor.u32 %v485_v0, %v373_v1  ;;  %v363_v7 = vld [vmem:[#allocation6 + $0x10] sm:$0xf]  ;;  %v484_v8 = vld [vmem:[#allocation6 + $0x14] sm:$0xf0] }
  0x1f   :  { %291 = vmatpush.bf16.msra.mxu2 %v392_v46  ;;  %v427_v9 = vld [vmem:[#allocation6 + $0x90] sm:$0xf]  ;;  %v440_v10 = vor.u32 %v501_v2, %v437_v3  ;;  %v500_v11 = vld [vmem:[#allocation6 + $0x94] sm:$0xf0]  ;;  %v483_v12 = vld [vmem:[#allocation6 + $0x14] sm:$0xf]  ;;  %v364_v16 = vor.u32 %v484_v8, %v363_v7 }
  0x20   :  { %304 = vmatpush.bf16.msra.mxu3 %v456_v50  ;;  %v365_v13 = vld [vmem:[#allocation6 + $0x18] sm:$0xf0]  ;;  %v499_v14 = vld [vmem:[#allocation6 + $0x94] sm:$0xf]  ;;  %v428_v17 = vor.u32 %v500_v11, %v427_v9  ;;  %v355_v19 = vld [vmem:[#allocation6] sm:$0xf] }
  0x21   :  { %266 = vmatpush.bf16.msra.mxu0 %v380_v56  ;;  %v429_v15 = vld [vmem:[#allocation6 + $0x98] sm:$0xf0]  ;;  %v368_v18 = vor.u32 %v483_v12, %v365_v13  ;;  %v482_v20 = vld [vmem:[#allocation6 + $0x4] sm:$0xf0]  ;;  %v419_v21 = vld [vmem:[#allocation6 + $0x80] sm:$0xf] }
  0x22   :  { %279 = vmatpush.bf16.msra.mxu1 %v444_v57  ;;  %v432_v22 = vor.u32 %v499_v14, %v429_v15  ;;  %v498_v23 = vld [vmem:[#allocation6 + $0x84] sm:$0xf0]  ;;  %v481_v24 = vld [vmem:[#allocation6 + $0x4] sm:$0xf]  ;;  %v357_v25 = vld [vmem:[#allocation6 + $0x8] sm:$0xf0]  ;;  %v356_v28 = vor.u32 %v482_v20, %v355_v19 }
  0x23   :  { %292 = vmatpush.bf16.msra.mxu2 %v384_v58  ;;  %v497_v26 = vld [vmem:[#allocation6 + $0x84] sm:$0xf]  ;;  %v421_v27 = vld [vmem:[#allocation6 + $0x88] sm:$0xf0]  ;;  %v66_v29 = vld [vmem:[#allocation3] sm:$0xff]  ;;  %v420_v30 = vor.u32 %v498_v23, %v419_v21  ;;  %v360_v31 = vor.u32 %v481_v24, %v357_v25  ;;  %s626_s0 = smov [#allocation9]  }
  0x24   :  { %305 = vmatpush.bf16.msra.mxu3 %v448_v62  ;;  %v67_v32 = vld [vmem:[#allocation3 + $0x8] sm:$0xff]  ;;  %v424_v33 = vor.u32 %v497_v26, %v421_v27  ;;  %v68_v34 = vpack.c.bf16 %v66_v29, %v66_v29  ;;  %v323_v36 = vld [vmem:[#allocation8] sm:$0x3]  ;;  %s340_s2 = sshll.u32 %s626_s0, 4  ;;  %s342_s30 = sshll.u32 %s662_s3, 4  ;;  %s341_s2 = int_to_ptr.vmem [resolvable:$true] %s340_s2  ;;  %s343_s30 = int_to_ptr.hbm [resolvable:$true] %s342_s30 }
  0x25   :  { %267 = vmatpush.bf16.msra.mxu0 %v372_v4  ;;  %v69_v35 = vpack.c.bf16 %v67_v32, %v67_v32  ;;  %v325_v38 = vperm.slane %v323_v36, 0  ;;  %v326_v44 = vperm.slane %v323_v36, 1 }
  0x26   :  { %280 = vmatpush.bf16.msra.mxu1 %v436_v5 }
  0x27   :  { %293 = vmatpush.bf16.msra.mxu2 %v376_v6 }
  0x28   :  { %306 = vmatpush.bf16.msra.mxu3 %v440_v10 }
  0x29   :  { %268 = vmatpush.bf16.msra.mxu0 %v364_v16 }
  0x2a   :  { %281 = vmatpush.bf16.msra.mxu1 %v428_v17 }
  0x2b   :  { %294 = vmatpush.bf16.msra.mxu2 %v368_v18 }
  0x2c   :  { %307 = vmatpush.bf16.msra.mxu3 %v432_v22 }
  0x2d   :  { %269 = vmatpush.bf16.msra.mxu0 %v356_v28 }
  0x2e   :  { %282 = vmatpush.bf16.msra.mxu1 %v420_v30 }
  0x2f   :  { %295 = vmatpush.bf16.msra.mxu2 %v360_v31 }
  0x30   :  { %308 = vmatpush.bf16.msra.mxu3 %v424_v33  ;;  %270 = vmatmul.bf16.vlgmr.msra.gmra.mxu0 %v68_v34 }
  0x31   :  { %283 = vmatmul.bf16.vlgmr.msra.gmra.mxu1 %v69_v35 }
  0x32   :  { %296 = vmatmul.bf16.vlgmr.msra.gmra.mxu2 %v68_v34 }
  0x33   :  { %309 = vmatmul.bf16.vlgmr.msra.gmra.mxu3 %v69_v35 }
  0xad   :  { %v271_v37 = vpop.f32.mrf.mxu0 }
  0xae   :  { %v284_v39 = vpop.f32.mrf.mxu1 }
  0xaf   :  { %v285_v40 = vadd.f32 %v284_v39, %v271_v37 }
  0xb1   :  { %v329_v41 = vadd.f32 %v325_v38, %v285_v40 }
  0xb3   :  { %v331_v42 = vmax.f32 %v329_v41, 0.0 }
  0xb5   :  { %v297_v43 = vpop.f32.mrf.mxu2  ;;  %333 = vst [vmem:[#allocation9] sm:$0xff] %v331_v42  ;;  %v273_v46 = vpop.f32.mrf.mxu0 }
  0xb6   :  { %v310_v45 = vpop.f32.mrf.mxu3  ;;  %v286_v48 = vpop.f32.mrf.mxu1 }
  0xb7   :  { %v311_v47 = vadd.f32 %v310_v45, %v297_v43 }
  0xb9   :  { %v330_v49 = vadd.f32 %v326_v44, %v311_v47 }
  0xbb   :  { %v332_v50 = vmax.f32 %v330_v49, 0.0 }
  0xbd   :  { %334 = vst [vmem:[#allocation9 + $0x8] sm:$0xff] %v332_v50  ;;  %v299_v51 = vpop.f32.mrf.mxu2 }
  0xbe   :  { %v312_v52 = vpop.f32.mrf.mxu3  ;;  %345 = dma.vmem_to_hbm [thread:$0]  %s341_s2, 256, %s343_s30, [#allocation5]  }
  0xbf   :  { %619 = dma.done.wait [#allocation5], 256  }
  0xc0   :  { %620 = vsyncadd [#allocation5], 4294967040 }
  0xc1   :  { %350 = vsyncpa [#allocation4], 1 }
  0xc2   :  { %351 = vsyncpa [#allocation7], 1 }
  0xc3   :  { %352 = vsyncpa [#allocation5], 1 }

</bundles_post_ra>
